<compile_context>
chip_gen: v7x
topology: tpu7x:2x2x1
jax: 0.10.0
libtpu: 0.0.40
codegen_flags: <defaults>
</compile_context>

<pallas_src>
import functools

import jax
import jax.numpy as jnp
import numpy as np
from jax.experimental import pallas as pl
from jax.experimental.pallas import tpu as pltpu

_VMEM = pltpu.MemorySpace.VMEM


# ----------------------------- fused kernel ----------------------------------
def _fused_mil_kernel(n_patches, hw, cf, l, hidden, nc, offs,
                      cols_ref, wf_ref, w1_ref, wc1m_ref, wc2_ref, small_ref,
                      out_ref, att_ref):
    o_bconv, o_b1, o_wa1, o_bc1, o_bc2, o_scal = offs

    # Small packed operands: static, lane-aligned slices of one VMEM ref.
    b_conv = small_ref[:, o_bconv:o_bconv + cf]        # (1, Cf)
    b1 = small_ref[:, o_b1:o_b1 + l]                   # (1, L)
    wa1 = small_ref[:, o_wa1:o_wa1 + l]                # (1, L)  (D == 1 row)
    bc1 = small_ref[:, o_bc1:o_bc1 + hidden]           # (1, 64) clin-folded
    bc2 = small_ref[:, o_bc2:o_bc2 + nc]               # (1, num_classes)
    ba1 = small_ref[:, o_scal + 0:o_scal + 1]          # (1, 1)
    wa2 = small_ref[:, o_scal + 1:o_scal + 2]          # (1, 1)
    ba2 = small_ref[:, o_scal + 2:o_scal + 3]          # (1, 1)

    # ---- backbone: one bf16 (N*HW, C*9) @ (C*9, Cf) MXU matmul + ReLU -------
    y = jnp.dot(cols_ref[...], wf_ref[...], preferred_element_type=jnp.float32)
    y = jnp.maximum(y + b_conv, 0.0)                    # (N*HW, Cf) f32

    # ---- global average pool: sublane-direction mean per patch (VPU) --------
    feats = jnp.mean(y.reshape(n_patches, hw, cf), axis=1)   # (N, Cf) f32

    # ---- attention aggregator -----------------------------------------------
    h = jnp.dot(feats.astype(w1_ref.dtype), w1_ref[...],
                preferred_element_type=jnp.float32) + b1
    h = jnp.maximum(h, 0.0)                             # (N, L) f32
    # L -> 1 contraction on VPU + lane-reduce (no 1-lane-output MXU matmul).
    pre = jnp.sum(h * wa1, axis=-1, keepdims=True) + ba1        # (N, 1)
    scores = jnp.tanh(pre) * wa2 + ba2                          # (N, 1)
    # softmax over the patch (sublane) axis of the (N, 1) column
    scores = scores - jnp.max(scores, axis=0, keepdims=True)
    e = jnp.exp(scores)
    att = e / jnp.sum(e, axis=0, keepdims=True)                 # (N, 1)
    att_ref[...] = att
    # aggregated feature m = att^T @ h via broadcast-multiply + N-row reduce
    m = jnp.sum(att * h, axis=0, keepdims=True)                 # (1, L)

    # ---- classifier (clinical contribution pre-folded into bc1) -------------
    hid = jnp.dot(m.astype(wc1m_ref.dtype), wc1m_ref[...],
                  preferred_element_type=jnp.float32) + bc1
    hid = jnp.maximum(hid, 0.0)                                 # (1, 64)
    out_ref[...] = (jnp.dot(hid.astype(wc2_ref.dtype), wc2_ref[...],
                            preferred_element_type=jnp.float32)
                    + bc2)                                      # (1, nc)


# ----------------------------- glue ------------------------------------------
def _im2col_3x3_same(x):
    # x: (N, C, H, W) -> (N*H*W, C*9) bf16 with column order (C, kh, kw)
    # (PyTorch OIHW flattening order).  Kept in the jitted wrapper: it feeds a
    # single lane-dense matmul and stays one XLA fusion; bf16 halves its HBM
    # traffic.
    x = x.astype(jnp.bfloat16)
    n, c, h, w = x.shape
    xp = jnp.pad(x, ((0, 0), (0, 0), (1, 1), (1, 1)))
    cols = [xp[:, :, kh:kh + h, kw:kw + w] for kh in range(3) for kw in range(3)]
    patches = jnp.stack(cols, axis=2)               # (N, C, 9, H, W)
    patches = patches.transpose(0, 3, 4, 1, 2)      # (N, H, W, C, 9)
    return patches.reshape(n * h * w, c * 9)


def _pack_segments(segs, align=128):
    # Flatten + f32-cast each small operand, pad each to a lane-aligned
    # length, and concatenate into one (1, K) row.  Offsets are static ints.
    parts, offsets, off = [], [], 0
    for s in segs:
        v = jnp.asarray(s, jnp.float32).reshape(-1)
        n = v.shape[0]
        padded = -(-n // align) * align
        parts.append(jnp.pad(v, (0, padded - n)))
        offsets.append(off)
        off += padded
    return jnp.concatenate(parts).reshape(1, -1), tuple(offsets)


@functools.partial(jax.jit, static_argnums=3)
def mil_net_forward(params, bag_data, clinical_data, expand_times):
    x = bag_data[0]                                  # squeeze(0): (N, C, H, W)
    n, c, h, w = x.shape
    hw = h * w
    cols = _im2col_3x3_same(x)                       # (N*HW, C*9) bf16

    w_conv = params["w_conv"]                        # (Cf, C, 3, 3)
    cf = w_conv.shape[0]
    w_flat = w_conv.reshape(cf, -1).T.astype(jnp.bfloat16)   # (C*9, Cf) bf16

    l = params["w1"].shape[1]
    d = params["wa1"].shape[1]
    assert d == 1, "MILNetWithClinicalData uses AttentionAggregator(..., 1)"
    hidden = params["wc1"].shape[1]
    num_classes = params["wc2"].shape[1]
    clin_size = clinical_data.shape[1]

    # torch.cat([m, clin.repeat(1,e)], -1) @ wc1 + bc1
    #   == m @ wc1[:L]  +  (clin @ sum_t wc1[L+t*S : L+(t+1)*S] + bc1)
    wc1 = params["wc1"]
    wc1_m = wc1[:l].astype(jnp.bfloat16)                               # (L, 64)
    wc1_clin = wc1[l:].reshape(expand_times, clin_size, -1).sum(axis=0)  # (S,64)
    bc1_eff = clinical_data.astype(jnp.float32) @ wc1_clin + params["bc1"][None, :]

    scalars = jnp.stack([params["ba1"][0], params["wa2"][0, 0], params["ba2"][0]])
    small, offs = _pack_segments([
        params["b_conv"],        # (Cf,)
        params["b1"],            # (L,)
        params["wa1"][:, 0],     # (L,)  attention first-layer weight as a row
        bc1_eff[0],              # (64,) classifier bias with clinical folded in
        params["bc2"],           # (num_classes,)
        scalars,                 # (3,)  ba1, wa2, ba2
    ])

    kernel = functools.partial(_fused_mil_kernel,
                               n, hw, cf, l, hidden, num_classes, offs)
    result, att_col = pl.pallas_call(
        kernel,
        out_shape=(jax.ShapeDtypeStruct((1, num_classes), jnp.float32),
                   jax.ShapeDtypeStruct((n, 1), jnp.float32)),
        in_specs=[pl.BlockSpec(memory_space=_VMEM)] * 6,
        out_specs=(pl.BlockSpec(memory_space=_VMEM),
                   pl.BlockSpec(memory_space=_VMEM)),
    )(cols, w_flat, params["w1"].astype(jnp.bfloat16), wc1_m,
      params["wc2"].astype(jnp.bfloat16), small)
    return result, att_col.reshape(1, n)


# ----------------- pure-JAX f32 reference for correctness check ---------------
def reference_forward(params, bag_data, clinical_data, expand_times):
    x = bag_data[0]
    y = jax.lax.conv_general_dilated(
        x, params["w_conv"], (1, 1), "SAME",
        dimension_numbers=("NCHW", "OIHW", "NCHW"))
    y = jax.nn.relu(y + params["b_conv"][None, :, None, None])
    feats = jnp.mean(y, axis=(2, 3))
    h = jax.nn.relu(feats @ params["w1"] + params["b1"])
    a = jnp.tanh(h @ params["wa1"] + params["ba1"]) @ params["wa2"] + params["ba2"]
    att = jax.nn.softmax(a.T, axis=1)
    m = att @ h
    clin = jnp.tile(clinical_data, (1, expand_times)).astype(jnp.float32)
    fused = jnp.concatenate([m, clin], axis=-1)
    hid = jax.nn.relu(fused @ params["wc1"] + params["bc1"])
    out = hid @ params["wc2"] + params["bc2"]
    return out, att


if __name__ == "__main__":
    NUM_CLASSES = 2
    CLIN = 23            # clinical_data_size
    EXPAND = 3           # expand_times
    N, C, H, W = 8, 3, 16, 16   # bag of 8 patches, 3x16x16 each
    CF = 32              # backbone output_features_size (synthetic backbone)
    L = 128              # AttentionAggregator.L
    D = 1                # inner attention size (second ctor arg)

    ks = jax.random.split(jax.random.PRNGKey(0), 16)
    s = 0.1
    params = {
        "w_conv": jax.random.normal(ks[0], (CF, C, 3, 3), jnp.float32) * s,
        "b_conv": jax.random.normal(ks[1], (CF,), jnp.float32) * s,
        "w1":  jax.random.normal(ks[2], (CF, L), jnp.float32) * s,
        "b1":  jax.random.normal(ks[3], (L,), jnp.float32) * s,
        "wa1": jax.random.normal(ks[4], (L, D), jnp.float32) * s,
        "ba1": jax.random.normal(ks[5], (D,), jnp.float32) * s,
        "wa2": jax.random.normal(ks[6], (D, 1), jnp.float32) * s,
        "ba2": jax.random.normal(ks[7], (1,), jnp.float32) * s,
        "wc1": jax.random.normal(ks[8], (L + CLIN * EXPAND, 64), jnp.float32) * s,
        "bc1": jax.random.normal(ks[9], (64,), jnp.float32) * s,
        "wc2": jax.random.normal(ks[10], (64, NUM_CLASSES), jnp.float32) * s,
        "bc2": jax.random.normal(ks[11], (NUM_CLASSES,), jnp.float32) * s,
    }

    bag_data = jax.random.normal(ks[12], (1, N, C, H, W), jnp.float32)
    clinical_data = jax.random.normal(ks[13], (1, CLIN), jnp.float32)

    result, attention = mil_net_forward(params, bag_data, clinical_data, EXPAND)
    jax.block_until_ready((result, attention))

    ref_result, ref_attention = reference_forward(params, bag_data, clinical_data, EXPAND)
    assert result.shape == (1, NUM_CLASSES) and attention.shape == (1, N)
    # bf16 MXU operands -> bf16-class tolerances vs the f32 reference.
    np.testing.assert_allclose(np.asarray(result), np.asarray(ref_result),
                               rtol=2e-2, atol=5e-3)
    np.testing.assert_allclose(np.asarray(attention), np.asarray(ref_attention),
                               rtol=2e-2, atol=1e-3)

    print("KERNEL_OK")
</pallas_src>

<mosaic_0001>
module attributes {stable_mosaic.version = 11 : i64} {
  func.func @_fused_mil_kernel(%arg0: memref<2048x27xbf16, #tpu.memory_space<vmem>>, %arg1: memref<27x32xbf16, #tpu.memory_space<vmem>>, %arg2: memref<32x128xbf16, #tpu.memory_space<vmem>>, %arg3: memref<128x64xbf16, #tpu.memory_space<vmem>>, %arg4: memref<64x2xbf16, #tpu.memory_space<vmem>>, %arg5: memref<1x768xf32, #tpu.memory_space<vmem>>, %arg6: memref<1x2xf32, #tpu.memory_space<vmem>>, %arg7: memref<8x1xf32, #tpu.memory_space<vmem>>) attributes {dimension_semantics = [], scalar_prefetch = 0 : i64, scratch_operands = 0 : i64, tpu.core_type = #tpu.core_type<tc>} {
    %c0 = arith.constant 0 : index
    %c0_0 = arith.constant 0 : index
    %0 = vector.load %arg5[%c0, %c0_0] : memref<1x768xf32, #tpu.memory_space<vmem>>, vector<1x32xf32>
    %c0_1 = arith.constant 0 : index
    %c128 = arith.constant 128 : index
    %1 = vector.load %arg5[%c0_1, %c128] : memref<1x768xf32, #tpu.memory_space<vmem>>, vector<1x128xf32>
    %c0_2 = arith.constant 0 : index
    %c256 = arith.constant 256 : index
    %2 = vector.load %arg5[%c0_2, %c256] : memref<1x768xf32, #tpu.memory_space<vmem>>, vector<1x128xf32>
    %c0_3 = arith.constant 0 : index
    %c384 = arith.constant 384 : index
    %3 = vector.load %arg5[%c0_3, %c384] : memref<1x768xf32, #tpu.memory_space<vmem>>, vector<1x64xf32>
    %c0_4 = arith.constant 0 : index
    %c512 = arith.constant 512 : index
    %4 = vector.load %arg5[%c0_4, %c512] : memref<1x768xf32, #tpu.memory_space<vmem>>, vector<1x2xf32>
    %c0_5 = arith.constant 0 : index
    %c640 = arith.constant 640 : index
    %5 = vector.load %arg5[%c0_5, %c640] : memref<1x768xf32, #tpu.memory_space<vmem>>, vector<1x1xf32>
    %c0_6 = arith.constant 0 : index
    %c641 = arith.constant 641 : index
    %6 = vector.load %arg5[%c0_6, %c641] : memref<1x768xf32, #tpu.memory_space<vmem>>, vector<1x1xf32>
    %c0_7 = arith.constant 0 : index
    %c642 = arith.constant 642 : index
    %7 = vector.load %arg5[%c0_7, %c642] : memref<1x768xf32, #tpu.memory_space<vmem>>, vector<1x1xf32>
    %c0_8 = arith.constant 0 : index
    %c0_9 = arith.constant 0 : index
    %8 = vector.load %arg0[%c0_8, %c0_9] : memref<2048x27xbf16, #tpu.memory_space<vmem>>, vector<2048x27xbf16>
    %c0_10 = arith.constant 0 : index
    %c0_11 = arith.constant 0 : index
    %9 = vector.load %arg1[%c0_10, %c0_11] : memref<27x32xbf16, #tpu.memory_space<vmem>>, vector<27x32xbf16>
    %cst = arith.constant dense<0.000000e+00> : vector<2048x32xf32>
    %10 = tpu.matmul %8, %9, %cst {dimension_numbers = #tpu.dot_dimension_numbers<[1], [0], [0], [1], [0, 0, 1, 1], [], []>} : vector<2048x27xbf16>, vector<27x32xbf16>, vector<2048x32xf32> -> vector<2048x32xf32>
    %11 = vector.broadcast %0 : vector<1x32xf32> to vector<2048x32xf32>
    %12 = arith.addf %10, %11 : vector<2048x32xf32>
    %cst_12 = arith.constant 0.000000e+00 : f32
    %13 = vector.broadcast %cst_12 : f32 to vector<2048x32xf32>
    %14 = arith.maximumf %12, %13 : vector<2048x32xf32>
    %15 = vector.shape_cast %14 : vector<2048x32xf32> to vector<8x256x32xf32>
    %cst_13 = arith.constant dense<0.000000e+00> : vector<8x32xf32>
    %16 = vector.multi_reduction <add>, %15, %cst_13 [1] : vector<8x256x32xf32> to vector<8x32xf32>
    %cst_14 = arith.constant 2.560000e+02 : f32
    %17 = vector.broadcast %cst_14 : f32 to vector<8x32xf32>
    %18 = arith.divf %16, %17 : vector<8x32xf32>
    %19 = arith.truncf %18 : vector<8x32xf32> to vector<8x32xbf16>
    %c0_15 = arith.constant 0 : index
    %c0_16 = arith.constant 0 : index
    %20 = vector.load %arg2[%c0_15, %c0_16] : memref<32x128xbf16, #tpu.memory_space<vmem>>, vector<32x128xbf16>
    %cst_17 = arith.constant dense<0.000000e+00> : vector<8x128xf32>
    %21 = tpu.matmul %19, %20, %cst_17 {dimension_numbers = #tpu.dot_dimension_numbers<[1], [0], [0], [1], [0, 0, 1, 1], [], []>} : vector<8x32xbf16>, vector<32x128xbf16>, vector<8x128xf32> -> vector<8x128xf32>
    %22 = vector.broadcast %1 : vector<1x128xf32> to vector<8x128xf32>
    %23 = arith.addf %21, %22 : vector<8x128xf32>
    %cst_18 = arith.constant 0.000000e+00 : f32
    %24 = vector.broadcast %cst_18 : f32 to vector<8x128xf32>
    %25 = arith.maximumf %23, %24 : vector<8x128xf32>
    %26 = vector.broadcast %2 : vector<1x128xf32> to vector<8x128xf32>
    %27 = arith.mulf %25, %26 : vector<8x128xf32>
    %cst_19 = arith.constant dense<0.000000e+00> : vector<8xf32>
    %28 = vector.multi_reduction <add>, %27, %cst_19 [1] : vector<8x128xf32> to vector<8xf32>
    %29 = vector.shape_cast %28 : vector<8xf32> to vector<8x1xf32>
    %30 = vector.broadcast %5 : vector<1x1xf32> to vector<8x1xf32>
    %31 = arith.addf %29, %30 : vector<8x1xf32>
    %32 = math.tanh %31 : vector<8x1xf32>
    %33 = vector.broadcast %6 : vector<1x1xf32> to vector<8x1xf32>
    %34 = arith.mulf %32, %33 : vector<8x1xf32>
    %35 = vector.broadcast %7 : vector<1x1xf32> to vector<8x1xf32>
    %36 = arith.addf %34, %35 : vector<8x1xf32>
    %cst_20 = arith.constant dense<0xFF800000> : vector<1xf32>
    %37 = vector.multi_reduction <maximumf>, %36, %cst_20 [0] : vector<8x1xf32> to vector<1xf32>
    %38 = vector.shape_cast %37 : vector<1xf32> to vector<1x1xf32>
    %39 = vector.broadcast %38 : vector<1x1xf32> to vector<8x1xf32>
    %40 = arith.subf %36, %39 : vector<8x1xf32>
    %41 = math.exp %40 : vector<8x1xf32>
    %cst_21 = arith.constant dense<0.000000e+00> : vector<1xf32>
    %42 = vector.multi_reduction <add>, %41, %cst_21 [0] : vector<8x1xf32> to vector<1xf32>
    %43 = vector.shape_cast %42 : vector<1xf32> to vector<1x1xf32>
    %44 = vector.broadcast %43 : vector<1x1xf32> to vector<8x1xf32>
    %45 = arith.divf %41, %44 : vector<8x1xf32>
    %c0_22 = arith.constant 0 : index
    %c0_23 = arith.constant 0 : index
    %46 = vector.load %arg7[%c0_22, %c0_23] : memref<8x1xf32, #tpu.memory_space<vmem>>, vector<8x1xf32>
    tpu.vector_store %arg7[%c0_22, %c0_23], %45 {strides = array<i32>} : memref<8x1xf32, #tpu.memory_space<vmem>>, vector<8x1xf32>,
    %47 = vector.broadcast %45 : vector<8x1xf32> to vector<8x128xf32>
    %48 = arith.mulf %47, %25 : vector<8x128xf32>
    %cst_24 = arith.constant dense<0.000000e+00> : vector<128xf32>
    %49 = vector.multi_reduction <add>, %48, %cst_24 [0] : vector<8x128xf32> to vector<128xf32>
    %50 = vector.shape_cast %49 : vector<128xf32> to vector<1x128xf32>
    %51 = arith.truncf %50 : vector<1x128xf32> to vector<1x128xbf16>
    %c0_25 = arith.constant 0 : index
    %c0_26 = arith.constant 0 : index
    %52 = vector.load %arg3[%c0_25, %c0_26] : memref<128x64xbf16, #tpu.memory_space<vmem>>, vector<128x64xbf16>
    %cst_27 = arith.constant dense<0.000000e+00> : vector<1x64xf32>
    %53 = tpu.matmul %51, %52, %cst_27 {dimension_numbers = #tpu.dot_dimension_numbers<[1], [0], [0], [1], [0, 0, 1, 1], [], []>} : vector<1x128xbf16>, vector<128x64xbf16>, vector<1x64xf32> -> vector<1x64xf32>
    %54 = arith.addf %53, %3 : vector<1x64xf32>
    %cst_28 = arith.constant 0.000000e+00 : f32
    %55 = vector.broadcast %cst_28 : f32 to vector<1x64xf32>
    %56 = arith.maximumf %54, %55 : vector<1x64xf32>
    %57 = arith.truncf %56 : vector<1x64xf32> to vector<1x64xbf16>
    %c0_29 = arith.constant 0 : index
    %c0_30 = arith.constant 0 : index
    %58 = vector.load %arg4[%c0_29, %c0_30] : memref<64x2xbf16, #tpu.memory_space<vmem>>, vector<64x2xbf16>
    %cst_31 = arith.constant dense<0.000000e+00> : vector<1x2xf32>
    %59 = tpu.matmul %57, %58, %cst_31 {dimension_numbers = #tpu.dot_dimension_numbers<[1], [0], [0], [1], [0, 0, 1, 1], [], []>} : vector<1x64xbf16>, vector<64x2xbf16>, vector<1x2xf32> -> vector<1x2xf32>
    %60 = arith.addf %59, %4 : vector<1x2xf32>
    %c0_32 = arith.constant 0 : index
    %c0_33 = arith.constant 0 : index
    %61 = vector.load %arg6[%c0_32, %c0_33] : memref<1x2xf32, #tpu.memory_space<vmem>>, vector<1x2xf32>
    tpu.vector_store %arg6[%c0_32, %c0_33], %60 {strides = array<i32>} : memref<1x2xf32, #tpu.memory_space<vmem>>, vector<1x2xf32>,
    return
  }
}

</mosaic_0001>

<bundles_post_ra>
// kernel: custom-call
= control target key start
LH: loop header
LB: loop body
LE: loop exit
PB: predicated region body
PF: predicated region fallthrough
CT: control target
= control target key end

     0   :  { %s6_s0 = inlined_call_operand.vmem [shape: f32[768], index: 0, kind: output, shape index: {}]  }

// kernel: mil_net_forward.1
= control target key start
LH: loop header
LB: loop body
LE: loop exit
PB: predicated region body
PF: predicated region fallthrough
CT: control target
= control target key end

     0   :  { %vm1335_vm0 = vcmask 1044480   ;;  %vm1336_vm1 = vcmask 1045504   ;;  %v4497_v2 = vmov 65535   ;;  %vm950_vm2 = vcmask 220160   ;;  %s5938_s0 = inlined_call_operand.vmem [shape: bf16[2048,27], index: 0, kind: input, shape index: {}]   ;;  %s5939_s1 = inlined_call_operand.vmem [shape: bf16[27,32], index: 1, kind: input, shape index: {}]   ;;  %s5940_s2 = inlined_call_operand.vmem [shape: bf16[32,128], index: 2, kind: input, shape index: {}]   ;;  %s5941_s3 = inlined_call_operand.vmem [shape: bf16[128,64], index: 3, kind: input, shape index: {}]   ;;  %s5942_s4 = inlined_call_operand.vmem [shape: bf16[64,2], index: 4, kind: input, shape index: {}]   ;;  %s5943_s5 = inlined_call_operand.vmem [shape: f32[1,768], index: 5, kind: input, shape index: {}]   ;;  %s5944_s6 = inlined_call_operand.hbm [shape: f32[1,2], index: 6, kind: output, shape index: {0}]   ;;  %s5945_s7 = inlined_call_operand.vmem [shape: f32[8,1], index: 7, kind: output, shape index: {1}]  }
   0x1   :  { %v4321_v0 = vld [vmem:[%s5939_s1] sm:$0xff]   ;;  %v4322_v1 = vld [vmem:[%s5939_s1 + $0x8] sm:$0x3f]   ;;  %v1337_v3 = vsel %vm1335_vm0, 4294967295, %v4497_v2  ;;  %v4325_v8 = vld [vmem:[%s5938_s0 + $0x10] sm:$0xff]  }
   0x2   :  { %4008 = vmatprep.subr.bf16.mxu0 %v4321_v0  ;;  %4308 = vmatprep.subr.bf16.mxu1 %v4321_v0  ;;  %v4323_v4 = vld [vmem:[%s5938_s0] sm:$0xff]   ;;  %v1338_v5 = vsel %vm1336_vm1, %v1337_v3, 0  ;;  %v4324_v7 = vld [vmem:[%s5938_s0 + $0x8] sm:$0xff]   ;;  %v4326_v9 = vld [vmem:[%s5938_s0 + $0x18] sm:$0xff]  }
   0x3   :  { %4009 = vmatpush3.bf16.msra.mxu0 %v4321_v0  ;;  %4310 = vmatpush3.bf16.msra.mxu1 %v4321_v0  ;;  %v1340_v6 = vand.u32 %v4322_v1, %v1338_v5  ;;  %v4327_v10 = vld [vmem:[%s5938_s0 + $0x20] sm:$0xff]   ;;  %v4328_v11 = vld [vmem:[%s5938_s0 + $0x28] sm:$0xff]   ;;  %v4329_v12 = vld [vmem:[%s5938_s0 + $0x30] sm:$0xff]  }
   0x4   :  { %4012 = vmatprep.mubr.msk.bf16.mxu0 %vm950_vm2, %v4323_v4  ;;  %v4345_v13 = vld [vmem:[%s5938_s0 + $0x240] sm:$0xff]   ;;  %v4346_v14 = vld [vmem:[%s5938_s0 + $0x248] sm:$0xff]   ;;  %v4349_v15 = vld [vmem:[%s5938_s0 + $0x250] sm:$0xff]  }
   0x5   :  { %4010 = vmatprep.subr.bf16.mxu0 %v1340_v6  ;;  %4309 = vmatprep.subr.bf16.mxu1 %v1340_v6  ;;  %v4330_v16 = vld [vmem:[%s5938_s0 + $0x38] sm:$0xff]   ;;  %v4331_v17 = vld [vmem:[%s5938_s0 + $0x40] sm:$0xff]   ;;  %v4332_v20 = vld [vmem:[%s5938_s0 + $0x48] sm:$0xff]  }
   0x6   :  { %4156 = vmatprep.mubr.msk.bf16.mxu1 %vm950_vm2, %v4345_v13  ;;  %v4350_v18 = vld [vmem:[%s5938_s0 + $0x258] sm:$0xff]   ;;  %v4353_v19 = vld [vmem:[%s5938_s0 + $0x260] sm:$0xff]   ;;  %v4333_v21 = vld [vmem:[%s5938_s0 + $0x50] sm:$0xff]  }
   0x7   :  { %4011 = vmatpush3.bf16.msra.mxu0 %v1340_v6  ;;  %4311 = vmatpush3.bf16.msra.mxu1 %v1340_v6  ;;  %v4354_v22 = vld [vmem:[%s5938_s0 + $0x268] sm:$0xff]   ;;  %v4357_v23 = vld [vmem:[%s5938_s0 + $0x270] sm:$0xff]   ;;  %v4334_v24 = vld [vmem:[%s5938_s0 + $0x58] sm:$0xff]  }
   0x8   :  { %v4335_v25 = vld [vmem:[%s5938_s0 + $0x60] sm:$0xff]   ;;  %v4358_v26 = vld [vmem:[%s5938_s0 + $0x278] sm:$0xff]   ;;  %v4336_v28 = vld [vmem:[%s5938_s0 + $0x68] sm:$0xff]  }
   0x9   :  { %v4361_v27 = vld [vmem:[%s5938_s0 + $0x280] sm:$0xff]   ;;  %v4337_v29 = vld [vmem:[%s5938_s0 + $0x70] sm:$0xff]   ;;  %v4362_v30 = vld [vmem:[%s5938_s0 + $0x288] sm:$0xff]  }
   0xa   :  { %4013 = vmatmul.mubr.msk.bf16.vlgmr.msra.gmra.mrb[0].mxu0 %vm950_vm2, %v4324_v7  ;;  %4157 = vmatmul.mubr.msk.bf16.vlgmr.msra.gmra.mrb[0].mxu1 %vm950_vm2, %v4346_v14  ;;  %v4365_v31 = vld [vmem:[%s5938_s0 + $0x290] sm:$0xff]   ;;  %v4338_v32 = vld [vmem:[%s5938_s0 + $0x78] sm:$0xff]   ;;  %v4339_v33 = vld [vmem:[%s5938_s0 + $0x80] sm:$0xff]  }
   0xb   :  { %4016 = vmatprep.mubr.msk.bf16.mxu0 %vm950_vm2, %v4325_v8  ;;  %4160 = vmatprep.mubr.msk.bf16.mxu1 %vm950_vm2, %v4349_v15  ;;  %v4366_v34 = vld [vmem:[%s5938_s0 + $0x298] sm:$0xff]   ;;  %v4369_v35 = vld [vmem:[%s5938_s0 + $0x2a0] sm:$0xff]   ;;  %v4340_v36 = vld [vmem:[%s5938_s0 + $0x88] sm:$0xff]  }
   0xc   :  { %v4341_v37 = vld [vmem:[%s5938_s0 + $0x90] sm:$0xff]   ;;  %v4370_v38 = vld [vmem:[%s5938_s0 + $0x2a8] sm:$0xff]   ;;  %v4342_v40 = vld [vmem:[%s5938_s0 + $0x98] sm:$0xff]  }
   0xd   :  { %v4373_v39 = vld [vmem:[%s5938_s0 + $0x2b0] sm:$0xff]   ;;  %v4343_v41 = vld [vmem:[%s5938_s0 + $0xa0] sm:$0xff]   ;;  %v4374_v42 = vld [vmem:[%s5938_s0 + $0x2b8] sm:$0xff]  }
   0xe   :  { %v4377_v43 = vld [vmem:[%s5938_s0 + $0x2c0] sm:$0xff]   ;;  %v4344_v44 = vld [vmem:[%s5938_s0 + $0xa8] sm:$0xff]   ;;  %v4347_v45 = vld [vmem:[%s5938_s0 + $0xb0] sm:$0xff]  }
   0xf   :  { %v4378_v46 = vld [vmem:[%s5938_s0 + $0x2c8] sm:$0xff]   ;;  %v4381_v47 = vld [vmem:[%s5938_s0 + $0x2d0] sm:$0xff]   ;;  %v4348_v48 = vld [vmem:[%s5938_s0 + $0xb8] sm:$0xff]  }
  0x10   :  { %v4351_v49 = vld [vmem:[%s5938_s0 + $0xc0] sm:$0xff]   ;;  %v4382_v50 = vld [vmem:[%s5938_s0 + $0x2d8] sm:$0xff]   ;;  %v4352_v52 = vld [vmem:[%s5938_s0 + $0xc8] sm:$0xff]  }
  0x11   :  { %v4385_v51 = vld [vmem:[%s5938_s0 + $0x2e0] sm:$0xff]   ;;  %v4355_v53 = vld [vmem:[%s5938_s0 + $0xd0] sm:$0xff]   ;;  %v4386_v54 = vld [vmem:[%s5938_s0 + $0x2e8] sm:$0xff]  }
  0x12   :  { %4017 = vmatmul.mubr.msk.bf16.gmra.mrb[4].mxu0 %vm950_vm2, %v4326_v9  ;;  %4161 = vmatmul.mubr.msk.bf16.gmra.mrb[4].mxu1 %vm950_vm2, %v4350_v18  ;;  %v4389_v55 = vld [vmem:[%s5938_s0 + $0x2f0] sm:$0xff]   ;;  %v4356_v56 = vld [vmem:[%s5938_s0 + $0xd8] sm:$0xff]   ;;  %v4359_v57 = vld [vmem:[%s5938_s0 + $0xe0] sm:$0xff]  }
  0x13   :  { %4020 = vmatprep.mubr.msk.bf16.mxu0 %vm950_vm2, %v4327_v10  ;;  %4164 = vmatprep.mubr.msk.bf16.mxu1 %vm950_vm2, %v4353_v19  ;;  %v4390_v58 = vld [vmem:[%s5938_s0 + $0x2f8] sm:$0xff]   ;;  %v4393_v59 = vld [vmem:[%s5938_s0 + $0x300] sm:$0xff]   ;;  %v4360_v60 = vld [vmem:[%s5938_s0 + $0xe8] sm:$0xff]  }
  0x14   :  { %v4363_v61 = vld [vmem:[%s5938_s0 + $0xf0] sm:$0xff]   ;;  %v4394_v62 = vld [vmem:[%s5938_s0 + $0x308] sm:$0xff]   ;;  %v4364_v0 = vld [vmem:[%s5938_s0 + $0xf8] sm:$0xff]  }
  0x15   :  { %v4397_v63 = vld [vmem:[%s5938_s0 + $0x310] sm:$0xff]   ;;  %v4367_v1 = vld [vmem:[%s5938_s0 + $0x100] sm:$0xff]   ;;  %v4398_v2 = vld [vmem:[%s5938_s0 + $0x318] sm:$0xff]  }
  0x16   :  { %v4401_v3 = vld [vmem:[%s5938_s0 + $0x320] sm:$0xff]  }
  0x1a   :  { %4021 = vmatmul.mubr.msk.bf16.gmra.mrb[8].mxu0 %vm950_vm2, %v4328_v11  ;;  %4165 = vmatmul.mubr.msk.bf16.gmra.mrb[8].mxu1 %vm950_vm2, %v4354_v22 }
  0x1b   :  { %4024 = vmatprep.mubr.msk.bf16.mxu0 %vm950_vm2, %v4329_v12  ;;  %4168 = vmatprep.mubr.msk.bf16.mxu1 %vm950_vm2, %v4357_v23 }
  0x22   :  { %4025 = vmatmul.mubr.msk.bf16.gmra.mrb[12].mxu0 %vm950_vm2, %v4330_v16  ;;  %4169 = vmatmul.mubr.msk.bf16.gmra.mrb[12].mxu1 %vm950_vm2, %v4358_v26 }
  0x23   :  { %4028 = vmatprep.mubr.msk.bf16.mxu0 %vm950_vm2, %v4331_v17  ;;  %4172 = vmatprep.mubr.msk.bf16.mxu1 %vm950_vm2, %v4361_v27 }
  0x2a   :  { %4029 = vmatmul.mubr.msk.bf16.gmra.mrb[16].mxu0 %vm950_vm2, %v4332_v20  ;;  %4173 = vmatmul.mubr.msk.bf16.gmra.mrb[16].mxu1 %vm950_vm2, %v4362_v30 }
  0x2b   :  { %4032 = vmatprep.mubr.msk.bf16.mxu0 %vm950_vm2, %v4333_v21  ;;  %4176 = vmatprep.mubr.msk.bf16.mxu1 %vm950_vm2, %v4365_v31 }
  0x32   :  { %4033 = vmatmul.mubr.msk.bf16.gmra.mrb[20].mxu0 %vm950_vm2, %v4334_v24  ;;  %4177 = vmatmul.mubr.msk.bf16.gmra.mrb[20].mxu1 %vm950_vm2, %v4366_v34 }
  0x33   :  { %4036 = vmatprep.mubr.msk.bf16.mxu0 %vm950_vm2, %v4335_v25  ;;  %4180 = vmatprep.mubr.msk.bf16.mxu1 %vm950_vm2, %v4369_v35 }
  0x3a   :  { %4037 = vmatmul.mubr.msk.bf16.gmra.mrb[24].mxu0 %vm950_vm2, %v4336_v28  ;;  %4181 = vmatmul.mubr.msk.bf16.gmra.mrb[24].mxu1 %vm950_vm2, %v4370_v38 }
  0x3b   :  { %4040 = vmatprep.mubr.msk.bf16.mxu0 %vm950_vm2, %v4337_v29  ;;  %4184 = vmatprep.mubr.msk.bf16.mxu1 %vm950_vm2, %v4373_v39 }
  0x42   :  { %4041 = vmatmul.mubr.msk.bf16.gmra.mrb[28].mxu0 %vm950_vm2, %v4338_v32  ;;  %4185 = vmatmul.mubr.msk.bf16.gmra.mrb[28].mxu1 %vm950_vm2, %v4374_v42 }
  0x43   :  { %4044 = vmatprep.mubr.msk.bf16.mxu0 %vm950_vm2, %v4339_v33  ;;  %4188 = vmatprep.mubr.msk.bf16.mxu1 %vm950_vm2, %v4377_v43 }
  0x4a   :  { %4045 = vmatmul.mubr.msk.bf16.gmra.mrb[32].mxu0 %vm950_vm2, %v4340_v36  ;;  %4189 = vmatmul.mubr.msk.bf16.gmra.mrb[32].mxu1 %vm950_vm2, %v4378_v46 }
  0x4b   :  { %4048 = vmatprep.mubr.msk.bf16.mxu0 %vm950_vm2, %v4341_v37  ;;  %4192 = vmatprep.mubr.msk.bf16.mxu1 %vm950_vm2, %v4381_v47 }
  0x52   :  { %4049 = vmatmul.mubr.msk.bf16.gmra.mrb[36].mxu0 %vm950_vm2, %v4342_v40  ;;  %4193 = vmatmul.mubr.msk.bf16.gmra.mrb[36].mxu1 %vm950_vm2, %v4382_v50 }
  0x53   :  { %4052 = vmatprep.mubr.msk.bf16.mxu0 %vm950_vm2, %v4343_v41  ;;  %4196 = vmatprep.mubr.msk.bf16.mxu1 %vm950_vm2, %v4385_v51 }
  0x5a   :  { %4053 = vmatmul.mubr.msk.bf16.gmra.mrb[40].mxu0 %vm950_vm2, %v4344_v44  ;;  %4197 = vmatmul.mubr.msk.bf16.gmra.mrb[40].mxu1 %vm950_vm2, %v4386_v54 }
  0x5b   :  { %4056 = vmatprep.mubr.msk.bf16.mxu0 %vm950_vm2, %v4347_v45  ;;  %4200 = vmatprep.mubr.msk.bf16.mxu1 %vm950_vm2, %v4389_v55 }
  0x62   :  { %4057 = vmatmul.mubr.msk.bf16.gmra.mrb[44].mxu0 %vm950_vm2, %v4348_v48  ;;  %4201 = vmatmul.mubr.msk.bf16.gmra.mrb[44].mxu1 %vm950_vm2, %v4390_v58 }
  0x63   :  { %4060 = vmatprep.mubr.msk.bf16.mxu0 %vm950_vm2, %v4351_v49  ;;  %4204 = vmatprep.mubr.msk.bf16.mxu1 %vm950_vm2, %v4393_v59 }
  0x6a   :  { %4061 = vmatmul.mubr.msk.bf16.gmra.mrb[48].mxu0 %vm950_vm2, %v4352_v52  ;;  %4205 = vmatmul.mubr.msk.bf16.gmra.mrb[48].mxu1 %vm950_vm2, %v4394_v62 }
  0x6b   :  { %4064 = vmatprep.mubr.msk.bf16.mxu0 %vm950_vm2, %v4355_v53  ;;  %4208 = vmatprep.mubr.msk.bf16.mxu1 %vm950_vm2, %v4397_v63 }
  0x72   :  { %4065 = vmatmul.mubr.msk.bf16.gmra.mrb[52].mxu0 %vm950_vm2, %v4356_v56  ;;  %4209 = vmatmul.mubr.msk.bf16.gmra.mrb[52].mxu1 %vm950_vm2, %v4398_v2 }
  0x73   :  { %4068 = vmatprep.mubr.msk.bf16.mxu0 %vm950_vm2, %v4359_v57 }
  0x7a   :  { %4069 = vmatmul.mubr.msk.bf16.gmra.mrb[56].mxu0 %vm950_vm2, %v4360_v60 }
  0x7b   :  { %4072 = vmatprep.mubr.msk.bf16.mxu0 %vm950_vm2, %v4363_v61 }
  0x82   :  { %4073 = vmatmul.mubr.msk.bf16.gmra.mrb[60].mxu0 %vm950_vm2, %v4364_v0 }
  0x83   :  { %4076 = vmatprep.mubr.msk.bf16.mxu0 %vm950_vm2, %v4367_v1 }
  0x84   :  { %13 = vsyncpa [#allocation3], 0  ;;  %4212 = vmatprep.mubr.msk.bf16.mxu1 %vm950_vm2, %v4401_v3  ;;  %v4368_v4 = vld [vmem:[%s5938_s0 + $0x108] sm:$0xff]   ;;  %v4371_v5 = vld [vmem:[%s5938_s0 + $0x110] sm:$0xff]   ;;  %vm2655_vm3 = vcmask 261120   ;;  %vm3251_vm4 = vcmask 1041409  }
  0x85   :  { %v4402_v6 = vld [vmem:[%s5938_s0 + $0x328] sm:$0xff]   ;;  %v4405_v7 = vld [vmem:[%s5938_s0 + $0x330] sm:$0xff]   ;;  %v4372_v8 = vld [vmem:[%s5938_s0 + $0x118] sm:$0xff]   ;;  %vm3253_vm5 = vcmask 1042434   ;;  %vm4499_vm6 = vmmov 0   ;;  %vm3255_vm7 = vcmask 1043459  }
  0x86   :  { %4213 = vmatmul.mubr.msk.bf16.gmra.mrb[56].mxu1 %vm950_vm2, %v4402_v6  ;;  %v4375_v9 = vld [vmem:[%s5938_s0 + $0x120] sm:$0xff]   ;;  %v4406_v10 = vld [vmem:[%s5938_s0 + $0x338] sm:$0xff]   ;;  %v4376_v12 = vld [vmem:[%s5938_s0 + $0x128] sm:$0xff]   ;;  %vm3257_vm8 = vcmask 1044484   ;;  %vm3259_vm9 = vcmask 1045509   ;;  %vm3261_vm10 = vcmask 1046534  }
  0x87   :  { %4216 = vmatprep.mubr.msk.bf16.mxu1 %vm950_vm2, %v4405_v7  ;;  %v4409_v11 = vld [vmem:[%s5938_s0 + $0x340] sm:$0xff]   ;;  %v4379_v13 = vld [vmem:[%s5938_s0 + $0x130] sm:$0xff]   ;;  %v4410_v14 = vld [vmem:[%s5938_s0 + $0x348] sm:$0xff]   ;;  %vm3263_vm11 = vcmask 1047559   ;;  %s4500_s30 = smov 126   ;;  %s4501_s11 = smov 127  }
  0x88   :  { %v4413_v15 = vld [vmem:[%s5938_s0 + $0x350] sm:$0xff]   ;;  %v4380_v16 = vld [vmem:[%s5938_s0 + $0x138] sm:$0xff]   ;;  %v4383_v17 = vld [vmem:[%s5938_s0 + $0x140] sm:$0xff]   ;;  %vm3347_vm12 = vcmask 7168   ;;  %vm3519_vm13 = vcmask 523264   ;;  %s4503_s14 = smov [#allocation2]  }
  0x89   :  { %v4414_v18 = vld [vmem:[%s5938_s0 + $0x358] sm:$0xff]   ;;  %v4417_v19 = vld [vmem:[%s5938_s0 + $0x360] sm:$0xff]   ;;  %v4384_v20 = vld [vmem:[%s5938_s0 + $0x148] sm:$0xff]   ;;  %vm3563_vm14 = vcmask 8192  }
  0x8a   :  { %4077 = vmatmul.mubr.msk.bf16.gmra.mrb[64].mxu0 %vm950_vm2, %v4368_v4  ;;  %v4387_v21 = vld [vmem:[%s5938_s0 + $0x150] sm:$0xff]   ;;  %v4418_v22 = vld [vmem:[%s5938_s0 + $0x368] sm:$0xff]   ;;  %v4388_v24 = vld [vmem:[%s5938_s0 + $0x158] sm:$0xff]  }
  0x8b   :  { %4080 = vmatprep.mubr.msk.bf16.mxu0 %vm950_vm2, %v4371_v5  ;;  %v4421_v23 = vld [vmem:[%s5938_s0 + $0x370] sm:$0xff]   ;;  %v4391_v25 = vld [vmem:[%s5938_s0 + $0x160] sm:$0xff]   ;;  %v4422_v26 = vld [vmem:[%s5938_s0 + $0x378] sm:$0xff]  }
  0x8c   :  { %v4425_v27 = vld [vmem:[%s5938_s0 + $0x380] sm:$0xff]   ;;  %v4392_v28 = vld [vmem:[%s5938_s0 + $0x168] sm:$0xff]   ;;  %v4395_v29 = vld [vmem:[%s5938_s0 + $0x170] sm:$0xff]  }
  0x8d   :  { %v4426_v30 = vld [vmem:[%s5938_s0 + $0x388] sm:$0xff]   ;;  %v4429_v31 = vld [vmem:[%s5938_s0 + $0x390] sm:$0xff]   ;;  %v4396_v32 = vld [vmem:[%s5938_s0 + $0x178] sm:$0xff]  }
  0x8e   :  { %4217 = vmatmul.mubr.msk.bf16.gmra.mrb[60].mxu1 %vm950_vm2, %v4406_v10  ;;  %v4399_v33 = vld [vmem:[%s5938_s0 + $0x180] sm:$0xff]   ;;  %v4430_v34 = vld [vmem:[%s5938_s0 + $0x398] sm:$0xff]   ;;  %v4400_v36 = vld [vmem:[%s5938_s0 + $0x188] sm:$0xff]  }
  0x8f   :  { %4220 = vmatprep.mubr.msk.bf16.mxu1 %vm950_vm2, %v4409_v11  ;;  %v4433_v35 = vld [vmem:[%s5938_s0 + $0x3a0] sm:$0xff]   ;;  %v4403_v37 = vld [vmem:[%s5938_s0 + $0x190] sm:$0xff]   ;;  %v4434_v38 = vld [vmem:[%s5938_s0 + $0x3a8] sm:$0xff]  }
  0x90   :  { %v4437_v39 = vld [vmem:[%s5938_s0 + $0x3b0] sm:$0xff]   ;;  %v4404_v40 = vld [vmem:[%s5938_s0 + $0x198] sm:$0xff]   ;;  %v4407_v41 = vld [vmem:[%s5938_s0 + $0x1a0] sm:$0xff]  }
  0x91   :  { %v4438_v42 = vld [vmem:[%s5938_s0 + $0x3b8] sm:$0xff]   ;;  %v4441_v43 = vld [vmem:[%s5938_s0 + $0x3c0] sm:$0xff]   ;;  %v4408_v44 = vld [vmem:[%s5938_s0 + $0x1a8] sm:$0xff]  }
  0x92   :  { %4081 = vmatmul.mubr.msk.bf16.gmra.mrb[68].mxu0 %vm950_vm2, %v4372_v8  ;;  %v4411_v45 = vld [vmem:[%s5938_s0 + $0x1b0] sm:$0xff]   ;;  %v4442_v46 = vld [vmem:[%s5938_s0 + $0x3c8] sm:$0xff]   ;;  %v4976_v48 = vld [vmem:[%s5943_s5] ss:$0 sm:$0xff] }
  0x93   :  { %4084 = vmatprep.mubr.msk.bf16.mxu0 %vm950_vm2, %v4375_v9  ;;  %v4445_v47 = vld [vmem:[%s5938_s0 + $0x3d0] sm:$0xff]   ;;  %v4412_v51 = vld [vmem:[%s5938_s0 + $0x1b8] sm:$0xff]   ;;  %v4415_v55 = vld [vmem:[%s5938_s0 + $0x1c0] sm:$0xff]  }
  0x94   :  { %v4446_v56 = vld [vmem:[%s5938_s0 + $0x3d8] sm:$0xff]   ;;  %v4447_v58 = vld [vmem:[%s5938_s0 + $0x3e0] sm:$0xff]   ;;  %v4416_v6 = vld [vmem:[%s5938_s0 + $0x1c8] sm:$0xff]  }
  0x95   :  { %v4419_v11 = vld [vmem:[%s5938_s0 + $0x1d0] sm:$0xff]  }
  0x96   :  { %4221 = vmatmul.mubr.msk.bf16.gmra.mrb[64].mxu1 %vm950_vm2, %v4410_v14 }
  0x97   :  { %4224 = vmatprep.mubr.msk.bf16.mxu1 %vm950_vm2, %v4413_v15  ;;  %v4449_v15 = vld [vmem:[%s5938_s0 + $0x3f0] sm:$0xff]  }
  0x9a   :  { %4085 = vmatmul.mubr.msk.bf16.gmra.mrb[72].mxu0 %vm950_vm2, %v4376_v12  ;;  %v4448_v12 = vld [vmem:[%s5938_s0 + $0x3e8] sm:$0xff]  }
  0x9b   :  { %4088 = vmatprep.mubr.msk.bf16.mxu0 %vm950_vm2, %v4379_v13 }
  0x9e   :  { %4225 = vmatmul.mubr.msk.bf16.gmra.mrb[68].mxu1 %vm950_vm2, %v4414_v18 }
  0x9f   :  { %4228 = vmatprep.mubr.msk.bf16.mxu1 %vm950_vm2, %v4417_v19 }
  0xa2   :  { %4089 = vmatmul.mubr.msk.bf16.gmra.mrb[76].mxu0 %vm950_vm2, %v4380_v16 }
  0xa3   :  { %4092 = vmatprep.mubr.msk.bf16.mxu0 %vm950_vm2, %v4383_v17 }
  0xa6   :  { %4229 = vmatmul.mubr.msk.bf16.gmra.mrb[72].mxu1 %vm950_vm2, %v4418_v22 }
  0xa7   :  { %4232 = vmatprep.mubr.msk.bf16.mxu1 %vm950_vm2, %v4421_v23 }
  0xaa   :  { %4093 = vmatmul.mubr.msk.bf16.gmra.mrb[80].mxu0 %vm950_vm2, %v4384_v20 }
  0xab   :  { %4096 = vmatprep.mubr.msk.bf16.mxu0 %vm950_vm2, %v4387_v21 }
  0xae   :  { %4233 = vmatmul.mubr.msk.bf16.gmra.mrb[76].mxu1 %vm950_vm2, %v4422_v26 }
  0xaf   :  { %4236 = vmatprep.mubr.msk.bf16.mxu1 %vm950_vm2, %v4425_v27 }
  0xb2   :  { %4097 = vmatmul.mubr.msk.bf16.gmra.mrb[84].mxu0 %vm950_vm2, %v4388_v24 }
  0xb3   :  { %4100 = vmatprep.mubr.msk.bf16.mxu0 %vm950_vm2, %v4391_v25 }
  0xb6   :  { %4237 = vmatmul.mubr.msk.bf16.gmra.mrb[80].mxu1 %vm950_vm2, %v4426_v30  ;;  %v4420_v30 = vld [vmem:[%s5938_s0 + $0x1d8] sm:$0xff]  }
  0xb7   :  { %4240 = vmatprep.mubr.msk.bf16.mxu1 %vm950_vm2, %v4429_v31 }
  0xba   :  { %4101 = vmatmul.mubr.msk.bf16.gmra.mrb[88].mxu0 %vm950_vm2, %v4392_v28 }
  0xbb   :  { %4104 = vmatprep.mubr.msk.bf16.mxu0 %vm950_vm2, %v4395_v29 }
  0xbe   :  { %4241 = vmatmul.mubr.msk.bf16.gmra.mrb[84].mxu1 %vm950_vm2, %v4430_v34 }
  0xbf   :  { %4244 = vmatprep.mubr.msk.bf16.mxu1 %vm950_vm2, %v4433_v35 }
  0xc2   :  { %4105 = vmatmul.mubr.msk.bf16.gmra.mrb[92].mxu0 %vm950_vm2, %v4396_v32 }
  0xc3   :  { %4108 = vmatprep.mubr.msk.bf16.mxu0 %vm950_vm2, %v4399_v33 }
  0xc6   :  { %4245 = vmatmul.mubr.msk.bf16.gmra.mrb[88].mxu1 %vm950_vm2, %v4434_v38 }
  0xc7   :  { %4248 = vmatprep.mubr.msk.bf16.mxu1 %vm950_vm2, %v4437_v39 }
  0xca   :  { %4109 = vmatmul.mubr.msk.bf16.gmra.mrb[96].mxu0 %vm950_vm2, %v4400_v36  ;;  %v4423_v36 = vld [vmem:[%s5938_s0 + $0x1e0] sm:$0xff]  }
  0xcb   :  { %4112 = vmatprep.mubr.msk.bf16.mxu0 %vm950_vm2, %v4403_v37  ;;  %v4450_v37 = vld [vmem:[%s5938_s0 + $0x3f8] sm:$0xff]  }
  0xce   :  { %4249 = vmatmul.mubr.msk.bf16.gmra.mrb[92].mxu1 %vm950_vm2, %v4438_v42 }
  0xcf   :  { %4252 = vmatprep.mubr.msk.bf16.mxu1 %vm950_vm2, %v4441_v43 }
  0xd2   :  { %4113 = vmatmul.mubr.msk.bf16.gmra.mrb[100].mxu0 %vm950_vm2, %v4404_v40 }
  0xd3   :  { %4116 = vmatprep.mubr.msk.bf16.mxu0 %vm950_vm2, %v4407_v41 }
  0xd6   :  { %4253 = vmatmul.mubr.msk.bf16.gmra.mrb[96].mxu1 %vm950_vm2, %v4442_v46 }
  0xd7   :  { %4256 = vmatprep.mubr.msk.bf16.mxu1 %vm950_vm2, %v4445_v47 }
  0xda   :  { %4117 = vmatmul.mubr.msk.bf16.gmra.mrb[104].mxu0 %vm950_vm2, %v4408_v44 }
  0xdb   :  { %4120 = vmatprep.mubr.msk.bf16.mxu0 %vm950_vm2, %v4411_v45 }
  0xdd   :  { %v4014_v49 = vpop.f32.mrb[0].mxu0  ;;  %v5028_v31 = vpop.f32.mrb[0].mxu1 }
  0xde   :  { %v1376_v50 = vpop.f32.mrb[1].mxu0  ;;  %v1385_v52 = vadd.f32 %v4014_v49, %v4976_v48  ;;  %4257 = vmatmul.mubr.msk.bf16.gmra.mrb[100].mxu1 %vm950_vm2, %v4446_v56  ;;  %v5039_v38 = vpop.f32.mrb[1].mxu1 }
  0xdf   :  { %v1377_v53 = vadd.f32 %v4976_v48, %v1376_v50  ;;  %v4015_v54 = vpop.f32.mrb[2].mxu0  ;;  %4260 = vmatprep.mubr.msk.bf16.mxu1 %vm950_vm2, %v4447_v58  ;;  %v5041_v41 = vpop.f32.mrb[2].mxu1  ;;  %v4424_v58 = vld [vmem:[%s5938_s0 + $0x1e8] sm:$0xff]  }
  0xe0   :  { %v1379_v57 = vpop.f32.mrb[3].mxu0  ;;  %v1388_v60 = vadd.f32 %v4015_v54, %v4976_v48  ;;  %v2401_v62 = vmax.f32 %v1385_v52, 0.0  ;;  %v5046_v46 = vpop.f32.mrb[3].mxu1 }
  0xe1   :  { %v2399_v59 = vmax.f32 %v1377_v53, 0.0  ;;  %v1380_v61 = vadd.f32 %v4976_v48, %v1379_v57 }
  0xe2   :  { %4121 = vmatmul.mubr.msk.bf16.gmra.mrb[108].mxu0 %vm950_vm2, %v4412_v51  ;;  %v2402_v1 = vmax.f32 %v1388_v60, 0.0  ;;  %v2659_v7 = vsel %vm2655_vm3, %v2401_v62, 0.0  ;;  %v4451_v60 = vld [vmem:[%s5940_s2] sm:$0xff]  }
  0xe3   :  { %v2400_v63 = vmax.f32 %v1380_v61, 0.0  ;;  %4124 = vmatprep.mubr.msk.bf16.mxu0 %vm950_vm2, %v4415_v55  ;;  %v2656_v0 = vsel %vm2655_vm3, %v2399_v59, 0.0 }
  0xe4   :  { %v2661_v16 = vsel %vm2655_vm3, %v2402_v1, 0.0  ;;  %v4427_v1 = vld [vmem:[%s5938_s0 + $0x1f0] sm:$0xff]  }
  0xe5   :  { %v2657_v2 = vsel %vm2655_vm3, %v2400_v63, 0.0  ;;  %v4018_v3 = vpop.f32.mrb[4].mxu0  ;;  %v5056_v59 = vpop.f32.mrb[4].mxu1 }
  0xe6   :  { %v2658_v4 = vadd.f32 %v2657_v2, %v2656_v0  ;;  %v1392_v5 = vpop.f32.mrb[5].mxu0  ;;  %v1401_v8 = vadd.f32 %v4018_v3, %v4976_v48  ;;  %4261 = vmatmul.mubr.msk.bf16.gmra.mrb[104].mxu1 %vm950_vm2, %v4448_v12  ;;  %v5067_v2 = vpop.f32.mrb[5].mxu1  ;;  %v4498_v3 = vmov 0.0  }
  0xe7   :  { %v1393_v9 = vadd.f32 %v4976_v48, %v1392_v5  ;;  %v4019_v10 = vpop.f32.mrb[6].mxu0  ;;  %4264 = vmatprep.mubr.msk.bf16.mxu1 %vm950_vm2, %v4449_v15  ;;  %4268 = vmatprep.subr.bf16.mxu1 %v4498_v3 }
  0xe8   :  { %v2660_v13 = vadd.f32 %v2659_v7, %v2658_v4  ;;  %v1395_v14 = vpop.f32.mrb[7].mxu0  ;;  %v1404_v18 = vadd.f32 %v4019_v10, %v4976_v48  ;;  %v2405_v21 = vmax.f32 %v1401_v8, 0.0  ;;  %4269 = vmatpush3.bf16.msra.mxu1 %v4451_v60  ;;  %v4435_v60 = vld [vmem:[%s5938_s0 + $0x210] sm:$0xff]  }
  0xe9   :  { %v2403_v17 = vmax.f32 %v1393_v9, 0.0  ;;  %v1396_v19 = vadd.f32 %v4976_v48, %v1395_v14  ;;  %4270 = vmatprep.subr.bf16.mxu1 %v4498_v3 }
  0xea   :  { %v2662_v20 = vadd.f32 %v2661_v16, %v2660_v13  ;;  %4125 = vmatmul.mubr.msk.bf16.gmra.mrb[112].mxu0 %vm950_vm2, %v4416_v6  ;;  %v2406_v25 = vmax.f32 %v1404_v18, 0.0  ;;  %v2667_v32 = vsel %vm2655_vm3, %v2405_v21, 0.0  ;;  %v5070_v6 = vpop.f32.mrb[6].mxu1 }
  0xeb   :  { %v2663_v22 = vsel %vm2655_vm3, %v2403_v17, 0.0  ;;  %v2404_v23 = vmax.f32 %v1396_v19, 0.0  ;;  %4128 = vmatprep.mubr.msk.bf16.mxu0 %vm950_vm2, %v4419_v11  ;;  %v5075_v11 = vpop.f32.mrb[7].mxu1 }
  0xec   :  { %v2664_v24 = vadd.f32 %v2663_v22, %v2662_v20  ;;  %v2669_v42 = vsel %vm2655_vm3, %v2406_v25, 0.0  ;;  %v4428_v22 = vld [vmem:[%s5938_s0 + $0x1f8] sm:$0xff]  }
  0xed   :  { %v2665_v26 = vsel %vm2655_vm3, %v2404_v23, 0.0  ;;  %v4022_v27 = vpop.f32.mrb[8].mxu0  ;;  %v5085_v23 = vpop.f32.mrb[8].mxu1 }
  0xee   :  { %v2666_v28 = vadd.f32 %v2665_v26, %v2664_v24  ;;  %v1408_v29 = vpop.f32.mrb[9].mxu0  ;;  %v1417_v33 = vadd.f32 %v4022_v27, %v4976_v48  ;;  %4265 = vmatmul.mubr.msk.bf16.gmra.mrb[108].mxu1 %vm950_vm2, %v4450_v37 }
  0xef   :  { %v1409_v34 = vadd.f32 %v4976_v48, %v1408_v29  ;;  %v4023_v35 = vpop.f32.mrb[10].mxu0  ;;  %v5093_v29 = vpop.f32.mrb[9].mxu1  ;;  %4272 = vmatprep.mubr.msk.bf16.mxu1 %vm4499_vm6, %v4498_v3 }
  0xf0   :  { %v2668_v39 = vadd.f32 %v2667_v32, %v2666_v28  ;;  %v1411_v40 = vpop.f32.mrb[11].mxu0  ;;  %v1420_v44 = vadd.f32 %v4023_v35, %v4976_v48  ;;  %v2409_v49 = vmax.f32 %v1417_v33, 0.0  ;;  %v4431_v28 = vld [vmem:[%s5938_s0 + $0x200] sm:$0xff]   ;;  %v5095_v33 = vpop.f32.mrb[10].mxu1 }
  0xf1   :  { %v2407_v43 = vmax.f32 %v1409_v34, 0.0  ;;  %v1412_v45 = vadd.f32 %v4976_v48, %v1411_v40 }
  0xf2   :  { %v2670_v47 = vadd.f32 %v2669_v42, %v2668_v39  ;;  %4129 = vmatmul.mubr.msk.bf16.gmra.mrb[116].mxu0 %vm950_vm2, %v4420_v30  ;;  %v2410_v53 = vmax.f32 %v1420_v44, 0.0  ;;  %v2675_v61 = vsel %vm2655_vm3, %v2409_v49, 0.0  ;;  %v5100_v39 = vpop.f32.mrb[11].mxu1 }
  0xf3   :  { %v2671_v50 = vsel %vm2655_vm3, %v2407_v43, 0.0  ;;  %v2408_v51 = vmax.f32 %v1412_v45, 0.0  ;;  %4132 = vmatprep.mubr.msk.bf16.mxu0 %vm950_vm2, %v4423_v36 }
  0xf4   :  { %v2672_v52 = vadd.f32 %v2671_v50, %v2670_v47  ;;  %v2677_v7 = vsel %vm2655_vm3, %v2410_v53, 0.0  ;;  %v4432_v53 = vld [vmem:[%s5938_s0 + $0x208] sm:$0xff]  }
  0xf5   :  { %v2673_v54 = vsel %vm2655_vm3, %v2408_v51, 0.0  ;;  %v4026_v55 = vpop.f32.mrb[12].mxu0 }
  0xf6   :  { %v2674_v56 = vadd.f32 %v2673_v54, %v2672_v52  ;;  %v1424_v57 = vpop.f32.mrb[13].mxu0  ;;  %v1433_v62 = vadd.f32 %v4026_v55, %v4976_v48  ;;  %v5109_v54 = vpop.f32.mrb[12].mxu1 }
  0xf7   :  { %v1425_v63 = vadd.f32 %v4976_v48, %v1424_v57  ;;  %v4027_v0 = vpop.f32.mrb[14].mxu0 }
  0xf8   :  { %v2676_v4 = vadd.f32 %v2675_v61, %v2674_v56  ;;  %v1427_v5 = vpop.f32.mrb[15].mxu0  ;;  %v1436_v9 = vadd.f32 %v4027_v0, %v4976_v48  ;;  %v2413_v13 = vmax.f32 %v1433_v62, 0.0  ;;  %v5117_v61 = vpop.f32.mrb[13].mxu1 }
  0xf9   :  { %v2411_v8 = vmax.f32 %v1425_v63, 0.0  ;;  %v1428_v10 = vadd.f32 %v4976_v48, %v1427_v5  ;;  %v5119_v0 = vpop.f32.mrb[14].mxu1 }
  0xfa   :  { %v2678_v12 = vadd.f32 %v2677_v7, %v2676_v4  ;;  %4133 = vmatmul.mubr.msk.bf16.gmra.mrb[120].mxu0 %vm950_vm2, %v4424_v58  ;;  %v2414_v17 = vmax.f32 %v1436_v9, 0.0  ;;  %v2683_v24 = vsel %vm2655_vm3, %v2413_v13, 0.0 }
  0xfb   :  { %v2679_v14 = vsel %vm2655_vm3, %v2411_v8, 0.0  ;;  %v2412_v15 = vmax.f32 %v1428_v10, 0.0  ;;  %4136 = vmatprep.mubr.msk.bf16.mxu0 %vm950_vm2, %v4427_v1  ;;  %v5124_v8 = vpop.f32.mrb[15].mxu1 }
  0xfc   :  { %v2680_v16 = vadd.f32 %v2679_v14, %v2678_v12  ;;  %v2685_v34 = vsel %vm2655_vm3, %v2414_v17, 0.0 }
  0xfd   :  { %v2681_v18 = vsel %vm2655_vm3, %v2412_v15, 0.0  ;;  %v4030_v19 = vpop.f32.mrb[16].mxu0 }
  0xfe   :  { %v2682_v20 = vadd.f32 %v2681_v18, %v2680_v16  ;;  %v1440_v21 = vpop.f32.mrb[17].mxu0  ;;  %v1449_v25 = vadd.f32 %v4030_v19, %v4976_v48 }
  0xff   :  { %v1441_v26 = vadd.f32 %v4976_v48, %v1440_v21  ;;  %v4031_v27 = vpop.f32.mrb[18].mxu0  ;;  %v4436_v21 = vld [vmem:[%s5938_s0 + $0x218] sm:$0xff]  }
 0x100   :  { %v2684_v30 = vadd.f32 %v2683_v24, %v2682_v20  ;;  %v1443_v32 = vpop.f32.mrb[19].mxu0  ;;  %v1452_v36 = vadd.f32 %v4031_v27, %v4976_v48  ;;  %v2417_v42 = vmax.f32 %v1449_v25, 0.0  ;;  %v4439_v27 = vld [vmem:[%s5938_s0 + $0x220] sm:$0xff]  }
 0x101   :  { %v2415_v35 = vmax.f32 %v1441_v26, 0.0  ;;  %v1444_v37 = vadd.f32 %v4976_v48, %v1443_v32 }
 0x102   :  { %v2686_v40 = vadd.f32 %v2685_v34, %v2684_v30  ;;  %4137 = vmatmul.mubr.msk.bf16.gmra.mrb[124].mxu0 %vm950_vm2, %v4428_v22  ;;  %v2418_v47 = vmax.f32 %v1452_v36, 0.0  ;;  %v2691_v55 = vsel %vm2655_vm3, %v2417_v42, 0.0  ;;  %v4174_v22 = vpop.f32.mrb[16].mxu1 }
 0x103   :  { %v2687_v43 = vsel %vm2655_vm3, %v2415_v35, 0.0  ;;  %v2416_v44 = vmax.f32 %v1444_v37, 0.0  ;;  %4140 = vmatprep.mubr.msk.bf16.mxu0 %vm950_vm2, %v4431_v28  ;;  %v2025_v28 = vadd.f32 %v4174_v22, %v4976_v48  ;;  %v2016_v30 = vpop.f32.mrb[17].mxu1 }
 0x104   :  { %v2688_v45 = vadd.f32 %v2687_v43, %v2686_v40  ;;  %v2693_v1 = vsel %vm2655_vm3, %v2418_v47, 0.0  ;;  %v4175_v36 = vpop.f32.mrb[18].mxu1  ;;  %v2017_v43 = vadd.f32 %v4976_v48, %v2016_v30 }
 0x105   :  { %v2689_v49 = vsel %vm2655_vm3, %v2416_v44, 0.0  ;;  %v4034_v50 = vpop.f32.mrb[20].mxu0  ;;  %v2019_v44 = vpop.f32.mrb[19].mxu1 }
 0x106   :  { %v2690_v51 = vadd.f32 %v2689_v49, %v2688_v45  ;;  %v1456_v52 = vpop.f32.mrb[21].mxu0  ;;  %v1465_v56 = vadd.f32 %v4034_v50, %v4976_v48  ;;  %v2028_v49 = vadd.f32 %v4175_v36, %v4976_v48 }
 0x107   :  { %v1457_v57 = vadd.f32 %v4976_v48, %v1456_v52  ;;  %v4035_v58 = vpop.f32.mrb[22].mxu0  ;;  %v2561_v52 = vmax.f32 %v2025_v28, 0.0 }
 0x108   :  { %v2692_v62 = vadd.f32 %v2691_v55, %v2690_v51  ;;  %v1459_v63 = vpop.f32.mrb[23].mxu0  ;;  %v1468_v5 = vadd.f32 %v4035_v58, %v4976_v48  ;;  %v2421_v10 = vmax.f32 %v1465_v56, 0.0 }
 0x109   :  { %v2419_v4 = vmax.f32 %v1457_v57, 0.0  ;;  %v1460_v7 = vadd.f32 %v4976_v48, %v1459_v63  ;;  %v2020_v57 = vadd.f32 %v4976_v48, %v2019_v44 }
 0x10a   :  { %v2694_v9 = vadd.f32 %v2693_v1, %v2692_v62  ;;  %4141 = vmatmul.mubr.msk.bf16.gmra.mrb[128].mxu0 %vm950_vm2, %v4432_v53  ;;  %v2422_v15 = vmax.f32 %v1468_v5, 0.0  ;;  %v2699_v24 = vsel %vm2655_vm3, %v2421_v10, 0.0  ;;  %v2559_v53 = vmax.f32 %v2017_v43, 0.0  ;;  %v4440_v5 = vld [vmem:[%s5938_s0 + $0x228] sm:$0xff]   ;;  %v4178_v10 = vpop.f32.mrb[20].mxu1 }
 0x10b   :  { %v2695_v12 = vsel %vm2655_vm3, %v2419_v4, 0.0  ;;  %v2420_v13 = vmax.f32 %v1460_v7, 0.0  ;;  %4144 = vmatprep.mubr.msk.bf16.mxu0 %vm950_vm2, %v4435_v60  ;;  %v2562_v62 = vmax.f32 %v2028_v49, 0.0  ;;  %v2041_v22 = vadd.f32 %v4178_v10, %v4976_v48 }
 0x10c   :  { %v2696_v14 = vadd.f32 %v2695_v12, %v2694_v9  ;;  %v2701_v37 = vsel %vm2655_vm3, %v2422_v15, 0.0  ;;  %v3001_v7 = vsel %vm2655_vm3, %v2559_v53, 0.0  ;;  %v2560_v9 = vmax.f32 %v2020_v57, 0.0  ;;  %v4443_v15 = vld [vmem:[%s5938_s0 + $0x230] sm:$0xff]  }
 0x10d   :  { %v2697_v16 = vsel %vm2655_vm3, %v2420_v13, 0.0  ;;  %v4038_v17 = vpop.f32.mrb[24].mxu0  ;;  %v2565_v44 = vmax.f32 %v2041_v22, 0.0 }
 0x10e   :  { %v2698_v18 = vadd.f32 %v2697_v16, %v2696_v14  ;;  %v1481_v19 = vadd.f32 %v4038_v17, %v4976_v48  ;;  %v1472_v20 = vpop.f32.mrb[25].mxu0  ;;  %v3004_v16 = vsel %vm2655_vm3, %v2561_v52, 0.0  ;;  %v2032_v17 = vpop.f32.mrb[21].mxu1 }
 0x10f   :  { %v1473_v25 = vadd.f32 %v4976_v48, %v1472_v20  ;;  %v4039_v26 = vpop.f32.mrb[26].mxu0  ;;  %v2033_v36 = vadd.f32 %v4976_v48, %v2032_v17 }
 0x110   :  { %v2700_v32 = vadd.f32 %v2699_v24, %v2698_v18  ;;  %v1484_v34 = vadd.f32 %v4039_v26, %v4976_v48  ;;  %v1475_v35 = vpop.f32.mrb[27].mxu0  ;;  %v2425_v45 = vmax.f32 %v1481_v19, 0.0  ;;  %v4179_v24 = vpop.f32.mrb[22].mxu1 }
 0x111   :  { %v2423_v40 = vmax.f32 %v1473_v25, 0.0  ;;  %v1476_v42 = vadd.f32 %v4976_v48, %v1475_v35  ;;  %v2035_v30 = vpop.f32.mrb[23].mxu1  ;;  %v3006_v35 = vsel %vm2655_vm3, %v2562_v62, 0.0 }
 0x112   :  { %v2702_v47 = vadd.f32 %v2701_v37, %v2700_v32  ;;  %4145 = vmatmul.mubr.msk.bf16.gmra.mrb[132].mxu0 %vm950_vm2, %v4436_v21  ;;  %v2426_v56 = vmax.f32 %v1484_v34, 0.0  ;;  %v2707_v12 = vsel %vm2655_vm3, %v2425_v45, 0.0  ;;  %v3002_v21 = vsel %vm2655_vm3, %v2560_v9, 0.0 }
 0x113   :  { %v2703_v50 = vsel %vm2655_vm3, %v2423_v40, 0.0  ;;  %v2424_v51 = vmax.f32 %v1476_v42, 0.0  ;;  %4148 = vmatprep.mubr.msk.bf16.mxu0 %vm950_vm2, %v4439_v27  ;;  %v3003_v28 = vadd.f32 %v3002_v21, %v3001_v7  ;;  %v2563_v45 = vmax.f32 %v2033_v36, 0.0 }
 0x114   :  { %v2704_v55 = vadd.f32 %v2703_v50, %v2702_v47  ;;  %v2709_v18 = vsel %vm2655_vm3, %v2426_v56, 0.0  ;;  %v2044_v47 = vadd.f32 %v4179_v24, %v4976_v48  ;;  %v2036_v53 = vadd.f32 %v4976_v48, %v2035_v30 }
 0x115   :  { %v2705_v58 = vsel %vm2655_vm3, %v2424_v51, 0.0  ;;  %v4042_v60 = vpop.f32.mrb[28].mxu0  ;;  %v3005_v42 = vadd.f32 %v3004_v16, %v3003_v28  ;;  %v3008_v62 = vsel %vm2655_vm3, %v2563_v45, 0.0 }
 0x116   :  { %v2706_v63 = vadd.f32 %v2705_v58, %v2704_v55  ;;  %v1497_v1 = vadd.f32 %v4042_v60, %v4976_v48  ;;  %v1488_v4 = vpop.f32.mrb[29].mxu0  ;;  %v4444_v60 = vld [vmem:[%s5938_s0 + $0x238] sm:$0xff]   ;;  %v2566_v7 = vmax.f32 %v2044_v47, 0.0  ;;  %v2564_v9 = vmax.f32 %v2036_v53, 0.0 }
 0x117   :  { %v1489_v13 = vadd.f32 %v4976_v48, %v1488_v4  ;;  %v4043_v14 = vpop.f32.mrb[30].mxu0  ;;  %v3007_v52 = vadd.f32 %v3006_v35, %v3005_v42 }
 0x118   :  { %v2708_v19 = vadd.f32 %v2707_v12, %v2706_v63  ;;  %v1491_v20 = vpop.f32.mrb[31].mxu0  ;;  %v1500_v26 = vadd.f32 %v4043_v14, %v4976_v48  ;;  %v2429_v32 = vmax.f32 %v1497_v1, 0.0  ;;  %v4182_v63 = vpop.f32.mrb[24].mxu1  ;;  %v3010_v21 = vsel %vm2655_vm3, %v2564_v9, 0.0 }
 0x119   :  { %v2427_v25 = vmax.f32 %v1489_v13, 0.0  ;;  %v1492_v27 = vadd.f32 %v4976_v48, %v1491_v20  ;;  %v2048_v10 = vpop.f32.mrb[25].mxu1  ;;  %v2057_v16 = vadd.f32 %v4182_v63, %v4976_v48  ;;  %v3014_v28 = vsel %vm2655_vm3, %v2566_v7, 0.0 }
 0x11a   :  { %v2710_v34 = vadd.f32 %v2709_v18, %v2708_v19  ;;  %4149 = vmatmul.mubr.msk.bf16.gmra.mrb[136].mxu0 %vm950_vm2, %v4440_v5  ;;  %v2430_v49 = vmax.f32 %v1500_v26, 0.0  ;;  %v2715_v55 = vsel %vm2655_vm3, %v2429_v32, 0.0  ;;  %v3009_v5 = vadd.f32 %v3008_v62, %v3007_v52  ;;  %v4183_v17 = vpop.f32.mrb[26].mxu1 }
 0x11b   :  { %v2711_v37 = vsel %vm2655_vm3, %v2427_v25, 0.0  ;;  %v2428_v40 = vmax.f32 %v1492_v27, 0.0  ;;  %4152 = vmatprep.mubr.msk.bf16.mxu0 %vm950_vm2, %v4443_v15  ;;  %v3012_v15 = vsel %vm2655_vm3, %v2565_v44, 0.0  ;;  %v2051_v22 = vpop.f32.mrb[27].mxu1  ;;  %v2049_v30 = vadd.f32 %v4976_v48, %v2048_v10 }
 0x11c   :  { %v2712_v43 = vadd.f32 %v2711_v37, %v2710_v34  ;;  %v2717_v18 = vsel %vm2655_vm3, %v2430_v49, 0.0  ;;  %v3011_v25 = vadd.f32 %v3010_v21, %v3009_v5  ;;  %v2569_v35 = vmax.f32 %v2057_v16, 0.0 }
 0x11d   :  { %v2713_v50 = vsel %vm2655_vm3, %v2428_v40, 0.0  ;;  %v4046_v51 = vpop.f32.mrb[32].mxu0  ;;  %v2567_v42 = vmax.f32 %v2049_v30, 0.0 }
 0x11e   :  { %v2714_v56 = vadd.f32 %v2713_v50, %v2712_v43  ;;  %v1513_v57 = vadd.f32 %v4046_v51, %v4976_v48  ;;  %v1504_v58 = vpop.f32.mrb[33].mxu0  ;;  %v3013_v34 = vadd.f32 %v3012_v15, %v3011_v25  ;;  %v2052_v43 = vadd.f32 %v4976_v48, %v2051_v22  ;;  %v4186_v51 = vpop.f32.mrb[28].mxu1 }
 0x11f   :  { %v1505_v1 = vadd.f32 %v4976_v48, %v1504_v58  ;;  %v4047_v4 = vpop.f32.mrb[34].mxu0  ;;  %v2060_v50 = vadd.f32 %v4183_v17, %v4976_v48  ;;  %v2064_v58 = vpop.f32.mrb[29].mxu1  ;;  %v3020_v15 = vsel %vm2655_vm3, %v2569_v35, 0.0  ;;  %v2073_v25 = vadd.f32 %v4186_v51, %v4976_v48 }
 0x120   :  { %v2716_v12 = vadd.f32 %v2715_v55, %v2714_v56  ;;  %v1516_v13 = vadd.f32 %v4047_v4, %v4976_v48  ;;  %v1507_v14 = vpop.f32.mrb[35].mxu0  ;;  %v2433_v26 = vmax.f32 %v1513_v57, 0.0  ;;  %v3015_v49 = vadd.f32 %v3014_v28, %v3013_v34  ;;  %v4187_v4 = vpop.f32.mrb[30].mxu1 }
 0x121   :  { %v2431_v19 = vmax.f32 %v1505_v1, 0.0  ;;  %v1508_v20 = vadd.f32 %v4976_v48, %v1507_v14  ;;  %v3016_v56 = vsel %vm2655_vm3, %v2567_v42, 0.0  ;;  %v2568_v57 = vmax.f32 %v2052_v43, 0.0 }
 0x122   :  { %v2718_v24 = vadd.f32 %v2717_v18, %v2716_v12  ;;  %4153 = vmatmul.mubr.msk.bf16.gmra.mrb[140].mxu0 %vm950_vm2, %v4444_v60  ;;  %v2434_v32 = vmax.f32 %v1516_v13, 0.0  ;;  %v2728_v52 = vsel %vm2655_vm3, %v2433_v26, 0.0  ;;  %v3017_v10 = vadd.f32 %v3016_v56, %v3015_v49  ;;  %v2067_v12 = vpop.f32.mrb[31].mxu1 }
 0x123   :  { %v2432_v27 = vmax.f32 %v1508_v20, 0.0  ;;  %v2725_v36 = vsel %vm2655_vm3, %v2431_v19, 0.0  ;;  %v2570_v16 = vmax.f32 %v2060_v50, 0.0  ;;  %v3018_v20 = vsel %vm2655_vm3, %v2568_v57, 0.0 }
 0x124   :  { %v2719_v60 = vrot.slane %v2718_v24, 4  ;;  %v2730_v5 = vsel %vm2655_vm3, %v2434_v32, 0.0  ;;  %v3019_v22 = vadd.f32 %v3018_v20, %v3017_v10  ;;  %v2065_v30 = vadd.f32 %v4976_v48, %v2064_v58 }
 0x125   :  { %v2726_v37 = vsel %vm2655_vm3, %v2432_v27, 0.0  ;;  %v4050_v40 = vpop.f32.mrb[36].mxu0 }
 0x126   :  { %v2727_v44 = vadd.f32 %v2726_v37, %v2725_v36  ;;  %v1529_v45 = vadd.f32 %v4050_v40, %v4976_v48  ;;  %v1520_v47 = vpop.f32.mrb[37].mxu0  ;;  %v5205_v26 = vadd.f32 %v2719_v60, %v2718_v24  ;;  %v3022_v36 = vsel %vm2655_vm3, %v2570_v16, 0.0  ;;  %v4190_v40 = vpop.f32.mrb[32].mxu1 }
 0x127   :  { %v1521_v53 = vadd.f32 %v4976_v48, %v1520_v47  ;;  %v4051_v55 = vpop.f32.mrb[38].mxu0  ;;  %v3021_v37 = vadd.f32 %v3020_v15, %v3019_v22  ;;  %v2080_v47 = vpop.f32.mrb[33].mxu1 }
 0x128   :  { %v2729_v62 = vadd.f32 %v2728_v52, %v2727_v44  ;;  %v1532_v63 = vadd.f32 %v4051_v55, %v4976_v48  ;;  %v1523_v1 = vpop.f32.mrb[39].mxu0  ;;  %v2437_v13 = vmax.f32 %v1529_v45, 0.0  ;;  %v2571_v45 = vmax.f32 %v2065_v30, 0.0  ;;  %v4191_v55 = vpop.f32.mrb[34].mxu1 }
 0x129   :  { %v2435_v7 = vmax.f32 %v1521_v53, 0.0  ;;  %v1524_v9 = vadd.f32 %v4976_v48, %v1523_v1  ;;  %v2573_v52 = vmax.f32 %v2073_v25, 0.0  ;;  %v2076_v53 = vadd.f32 %v4187_v4, %v4976_v48 }
 0x12a   :  { %v2731_v14 = vadd.f32 %v2730_v5, %v2729_v62  ;;  %v2438_v18 = vmax.f32 %v1532_v63, 0.0  ;;  %v2736_v42 = vsel %vm2655_vm3, %v2437_v13, 0.0  ;;  %v3023_v58 = vadd.f32 %v3022_v36, %v3021_v37  ;;  %v2083_v62 = vpop.f32.mrb[35].mxu1 }
 0x12b   :  { %v2732_v17 = vsel %vm2655_vm3, %v2435_v7, 0.0  ;;  %v2436_v19 = vmax.f32 %v1524_v9, 0.0  ;;  %v3024_v60 = vsel %vm2655_vm3, %v2571_v45, 0.0  ;;  %v2721_v13 = vrot.slane %v5205_v26, 2 }
 0x12c   :  { %v2733_v21 = vadd.f32 %v2732_v17, %v2731_v14  ;;  %v2738_v43 = vsel %vm2655_vm3, %v2438_v18, 0.0  ;;  %v3025_v10 = vadd.f32 %v3024_v60, %v3023_v58  ;;  %v2068_v4 = vadd.f32 %v4976_v48, %v2067_v12 }
 0x12d   :  { %v2734_v27 = vsel %vm2655_vm3, %v2436_v19, 0.0  ;;  %v4054_v28 = vpop.f32.mrb[40].mxu0  ;;  %v3028_v17 = vsel %vm2655_vm3, %v2573_v52, 0.0  ;;  %v2574_v18 = vmax.f32 %v2076_v53, 0.0  ;;  %v2081_v19 = vadd.f32 %v4976_v48, %v2080_v47 }
 0x12e   :  { %v2735_v32 = vadd.f32 %v2734_v27, %v2733_v21  ;;  %v1545_v34 = vadd.f32 %v4054_v28, %v4976_v48  ;;  %v1536_v35 = vpop.f32.mrb[41].mxu0  ;;  %v2572_v25 = vmax.f32 %v2068_v4, 0.0  ;;  %v2089_v27 = vadd.f32 %v4190_v40, %v4976_v48  ;;  %v4194_v28 = vpop.f32.mrb[36].mxu1 }
 0x12f   :  { %v1537_v24 = vadd.f32 %v4976_v48, %v1536_v35  ;;  %v4055_v44 = vpop.f32.mrb[42].mxu0  ;;  %v2084_v35 = vadd.f32 %v4976_v48, %v2083_v62  ;;  %v2096_v36 = vpop.f32.mrb[37].mxu1  ;;  %v5235_v52 = vadd.f32 %v2721_v13, %v5205_v26 }
 0x130   :  { %v2737_v49 = vadd.f32 %v2736_v42, %v2735_v32  ;;  %v1548_v50 = vadd.f32 %v4055_v44, %v4976_v48  ;;  %v1539_v51 = vpop.f32.mrb[43].mxu0  ;;  %v2441_v63 = vmax.f32 %v1545_v34, 0.0  ;;  %v2575_v44 = vmax.f32 %v2081_v19, 0.0  ;;  %v4195_v45 = vpop.f32.mrb[38].mxu1 }
 0x131   :  { %v2439_v56 = vmax.f32 %v1537_v24, 0.0  ;;  %v1540_v57 = vadd.f32 %v4976_v48, %v1539_v51  ;;  %v3026_v24 = vsel %vm2655_vm3, %v2572_v25, 0.0  ;;  %v2099_v51 = vpop.f32.mrb[39].mxu1  ;;  %v2097_v13 = vadd.f32 %v4976_v48, %v2096_v36 }
 0x132   :  { %v2739_v1 = vadd.f32 %v2738_v43, %v2737_v49  ;;  %v2442_v7 = vmax.f32 %v1548_v50, 0.0  ;;  %v2744_v20 = vsel %vm2655_vm3, %v2441_v63, 0.0  ;;  %v3027_v49 = vadd.f32 %v3026_v24, %v3025_v10  ;;  %v4198_v19 = vpop.f32.mrb[40].mxu1 }
 0x133   :  { %v2740_v5 = vsel %vm2655_vm3, %v2439_v56, 0.0  ;;  %v2440_v9 = vmax.f32 %v1540_v57, 0.0  ;;  %v2092_v50 = vadd.f32 %v4191_v55, %v4976_v48  ;;  %v3030_v56 = vsel %vm2655_vm3, %v2574_v18, 0.0 }
 0x134   :  { %v2741_v14 = vadd.f32 %v2740_v5, %v2739_v1  ;;  %v2746_v30 = vsel %vm2655_vm3, %v2442_v7, 0.0  ;;  %v2577_v57 = vmax.f32 %v2089_v27, 0.0  ;;  %v3029_v63 = vadd.f32 %v3028_v17, %v3027_v49 }
 0x135   :  { %v2742_v15 = vsel %vm2655_vm3, %v2440_v9, 0.0  ;;  %v4058_v16 = vpop.f32.mrb[44].mxu0  ;;  %v3032_v7 = vsel %vm2655_vm3, %v2575_v44, 0.0  ;;  %v2576_v9 = vmax.f32 %v2084_v35, 0.0  ;;  %v2578_v26 = vmax.f32 %v2092_v50, 0.0 }
 0x136   :  { %v2743_v21 = vadd.f32 %v2742_v15, %v2741_v14  ;;  %v1552_v22 = vpop.f32.mrb[45].mxu0  ;;  %v1561_v12 = vadd.f32 %v4058_v16, %v4976_v48  ;;  %v3031_v14 = vadd.f32 %v3030_v56, %v3029_v63  ;;  %v2105_v17 = vadd.f32 %v4194_v28, %v4976_v48 }
 0x137   :  { %v1553_v32 = vadd.f32 %v4976_v48, %v1552_v22  ;;  %v4059_v34 = vpop.f32.mrb[46].mxu0  ;;  %v3034_v18 = vsel %vm2655_vm3, %v2576_v9, 0.0  ;;  %v3036_v25 = vsel %vm2655_vm3, %v2577_v57, 0.0  ;;  %v2579_v36 = vmax.f32 %v2097_v13, 0.0 }
 0x138   :  { %v2745_v37 = vadd.f32 %v2744_v20, %v2743_v21  ;;  %v1564_v42 = vadd.f32 %v4059_v34, %v4976_v48  ;;  %v1555_v43 = vpop.f32.mrb[47].mxu0  ;;  %v2445_v58 = vmax.f32 %v1561_v12, 0.0  ;;  %v3033_v27 = vadd.f32 %v3032_v7, %v3031_v14 }
 0x139   :  { %v2443_v40 = vmax.f32 %v1553_v32, 0.0  ;;  %v1556_v47 = vadd.f32 %v4976_v48, %v1555_v43  ;;  %v2108_v24 = vadd.f32 %v4195_v45, %v4976_v48  ;;  %v3038_v49 = vsel %vm2655_vm3, %v2578_v26, 0.0 }
 0x13a   :  { %v2747_v53 = vadd.f32 %v2746_v30, %v2745_v37  ;;  %v2446_v5 = vmax.f32 %v1564_v42, 0.0  ;;  %v2752_v20 = vsel %vm2655_vm3, %v2445_v58, 0.0  ;;  %v2112_v30 = vpop.f32.mrb[41].mxu1  ;;  %v3035_v43 = vadd.f32 %v3034_v18, %v3033_v27 }
 0x13b   :  { %v2748_v60 = vsel %vm2655_vm3, %v2443_v40, 0.0  ;;  %v2444_v62 = vmax.f32 %v1556_v47, 0.0  ;;  %v4199_v37 = vpop.f32.mrb[42].mxu1  ;;  %v2581_v50 = vmax.f32 %v2105_v17, 0.0  ;;  %v2100_v58 = vadd.f32 %v4976_v48, %v2099_v51 }
 0x13c   :  { %v2749_v1 = vadd.f32 %v2748_v60, %v2747_v53  ;;  %v2754_v12 = vsel %vm2655_vm3, %v2446_v5, 0.0  ;;  %v2115_v44 = vpop.f32.mrb[43].mxu1  ;;  %v3037_v57 = vadd.f32 %v3036_v25, %v3035_v43  ;;  %v3040_v63 = vsel %vm2655_vm3, %v2579_v36, 0.0 }
 0x13d   :  { %v2750_v55 = vsel %vm2655_vm3, %v2444_v62, 0.0  ;;  %v4062_v10 = vpop.f32.mrb[48].mxu0  ;;  %v2582_v9 = vmax.f32 %v2108_v24, 0.0  ;;  %v3044_v13 = vsel %vm2655_vm3, %v2581_v50, 0.0  ;;  %v2121_v51 = vadd.f32 %v4198_v19, %v4976_v48 }
 0x13e   :  { %v2751_v4 = vadd.f32 %v2750_v55, %v2749_v1  ;;  %v1577_v15 = vadd.f32 %v4062_v10, %v4976_v48  ;;  %v1568_v16 = vpop.f32.mrb[49].mxu0  ;;  %v2113_v1 = vadd.f32 %v4976_v48, %v2112_v30  ;;  %v3039_v7 = vadd.f32 %v3038_v49, %v3037_v57 }
 0x13f   :  { %v1569_v21 = vadd.f32 %v4976_v48, %v1568_v16  ;;  %v4063_v22 = vpop.f32.mrb[50].mxu0  ;;  %v2580_v55 = vmax.f32 %v2100_v58, 0.0  ;;  %v2124_v36 = vadd.f32 %v4199_v37, %v4976_v48  ;;  %v3046_v24 = vsel %vm2655_vm3, %v2582_v9, 0.0 }
 0x140   :  { %v2753_v32 = vadd.f32 %v2752_v20, %v2751_v4  ;;  %v1580_v34 = vadd.f32 %v4063_v22, %v4976_v48  ;;  %v1571_v35 = vpop.f32.mrb[51].mxu0  ;;  %v2449_v40 = vmax.f32 %v1577_v15, 0.0  ;;  %v4202_v4 = vpop.f32.mrb[44].mxu1  ;;  %v3041_v17 = vadd.f32 %v3040_v63, %v3039_v7 }
 0x141   :  { %v2447_v42 = vmax.f32 %v1569_v21, 0.0  ;;  %v1572_v28 = vadd.f32 %v4976_v48, %v1571_v35  ;;  %v3042_v20 = vsel %vm2655_vm3, %v2580_v55, 0.0  ;;  %v2128_v21 = vpop.f32.mrb[45].mxu1 }
 0x142   :  { %v2755_v47 = vadd.f32 %v2754_v12, %v2753_v32  ;;  %v2450_v62 = vmax.f32 %v1580_v34, 0.0  ;;  %v2760_v15 = vsel %vm2655_vm3, %v2449_v40, 0.0  ;;  %v2583_v12 = vmax.f32 %v2113_v1, 0.0  ;;  %v4203_v32 = vpop.f32.mrb[46].mxu1 }
 0x143   :  { %v2756_v53 = vsel %vm2655_vm3, %v2447_v42, 0.0  ;;  %v2448_v56 = vmax.f32 %v1572_v28, 0.0  ;;  %v3043_v35 = vadd.f32 %v3042_v20, %v3041_v17  ;;  %v2131_v42 = vpop.f32.mrb[47].mxu1  ;;  %v2585_v40 = vmax.f32 %v2121_v51, 0.0 }
 0x144   :  { %v2757_v60 = vadd.f32 %v2756_v53, %v2755_v47  ;;  %v2762_v22 = vsel %vm2655_vm3, %v2450_v62, 0.0  ;;  %v2116_v53 = vadd.f32 %v4976_v48, %v2115_v44  ;;  %v3048_v58 = vsel %vm2655_vm3, %v2583_v12, 0.0 }
 0x145   :  { %v2758_v45 = vsel %vm2655_vm3, %v2448_v56, 0.0  ;;  %v4066_v5 = vpop.f32.mrb[52].mxu0  ;;  %v3045_v50 = vadd.f32 %v3044_v13, %v3043_v35  ;;  %v2586_v1 = vmax.f32 %v2124_v36, 0.0  ;;  %v3052_v55 = vsel %vm2655_vm3, %v2585_v40, 0.0 }
 0x146   :  { %v2759_v10 = vadd.f32 %v2758_v45, %v2757_v60  ;;  %v1593_v14 = vadd.f32 %v4066_v5, %v4976_v48  ;;  %v1584_v26 = vpop.f32.mrb[53].mxu0  ;;  %v2129_v60 = vadd.f32 %v4976_v48, %v2128_v21  ;;  %v2584_v45 = vmax.f32 %v2116_v53, 0.0 }
 0x147   :  { %v1585_v16 = vadd.f32 %v4976_v48, %v1584_v26  ;;  %v4067_v18 = vpop.f32.mrb[54].mxu0  ;;  %v3047_v63 = vadd.f32 %v3046_v24, %v3045_v50  ;;  %v2137_v44 = vadd.f32 %v4202_v4, %v4976_v48  ;;  %v4452_v4 = vld [vmem:[%s5940_s2 + $0x8] sm:$0xff]  }
 0x148   :  { %v2761_v25 = vadd.f32 %v2760_v15, %v2759_v10  ;;  %v1596_v27 = vadd.f32 %v4067_v18, %v4976_v48  ;;  %v1587_v30 = vpop.f32.mrb[55].mxu0  ;;  %v2453_v28 = vmax.f32 %v1593_v14, 0.0  ;;  %v4206_v10 = vpop.f32.mrb[48].mxu1  ;;  %v3050_v15 = vsel %vm2655_vm3, %v2584_v45, 0.0  ;;  %4271 = vmatpush3.bf16.msra.mxu1 %v4452_v4 }
 0x149   :  { %v2451_v34 = vmax.f32 %v1585_v16, 0.0  ;;  %v1588_v19 = vadd.f32 %v4976_v48, %v1587_v30  ;;  %v3049_v51 = vadd.f32 %v3048_v58, %v3047_v63  ;;  %v2144_v16 = vpop.f32.mrb[49].mxu1  ;;  %v2587_v21 = vmax.f32 %v2129_v60, 0.0  ;;  %4276 = vmatprep.subr.bf16.mxu1 %v4498_v3 }
 0x14a   :  { %v2763_v43 = vadd.f32 %v2762_v22, %v2761_v25  ;;  %v2454_v57 = vmax.f32 %v1596_v27, 0.0  ;;  %v2768_v14 = vsel %vm2655_vm3, %v2453_v28, 0.0  ;;  %v2140_v22 = vadd.f32 %v4203_v32, %v4976_v48  ;;  %v4207_v25 = vpop.f32.mrb[50].mxu1 }
 0x14b   :  { %v2764_v47 = vsel %vm2655_vm3, %v2451_v34, 0.0  ;;  %v2452_v49 = vmax.f32 %v1588_v19, 0.0  ;;  %v3051_v34 = vadd.f32 %v3050_v15, %v3049_v51  ;;  %v2147_v19 = vpop.f32.mrb[51].mxu1  ;;  %v3054_v28 = vsel %vm2655_vm3, %v2586_v1, 0.0 }
 0x14c   :  { %v2765_v56 = vadd.f32 %v2764_v47, %v2763_v43  ;;  %v2770_v18 = vsel %vm2655_vm3, %v2454_v57, 0.0  ;;  %v2589_v43 = vmax.f32 %v2137_v44, 0.0  ;;  %v5292_v47 = vld [vmem:[%s5943_s5] ss:$0 sm:$0xff]  ;;  %v3056_v50 = vsel %vm2655_vm3, %v2587_v21, 0.0 }
 0x14d   :  { %v2766_v37 = vsel %vm2655_vm3, %v2452_v49, 0.0  ;;  %v4070_v62 = vpop.f32.mrb[56].mxu0  ;;  %v3053_v40 = vadd.f32 %v3052_v55, %v3051_v34  ;;  %v2132_v49 = vadd.f32 %v5292_v47, %v2131_v42  ;;  %v2590_v53 = vmax.f32 %v2140_v22, 0.0 }
 0x14e   :  { %v2767_v5 = vadd.f32 %v2766_v37, %v2765_v56  ;;  %v1609_v7 = vadd.f32 %v4070_v62, %v4976_v48  ;;  %v1600_v9 = vpop.f32.mrb[57].mxu0  ;;  %v2145_v56 = vadd.f32 %v5292_v47, %v2144_v16  ;;  %v3060_v42 = vsel %vm2655_vm3, %v2589_v43, 0.0 }
 0x14f   :  { %v1601_v26 = vadd.f32 %v4976_v48, %v1600_v9  ;;  %v4071_v13 = vpop.f32.mrb[58].mxu0  ;;  %v3055_v37 = vadd.f32 %v3054_v28, %v3053_v40  ;;  %v2588_v62 = vmax.f32 %v2132_v49, 0.0  ;;  %v3062_v34 = vsel %vm2655_vm3, %v2590_v53, 0.0 }
 0x150   :  { %v2769_v17 = vadd.f32 %v2768_v14, %v2767_v5  ;;  %v1603_v20 = vpop.f32.mrb[59].mxu0  ;;  %v1612_v30 = vadd.f32 %v4071_v13, %v4976_v48  ;;  %v2457_v35 = vmax.f32 %v1609_v7, 0.0  ;;  %v2153_v5 = vadd.f32 %v5292_v47, %v4206_v10  ;;  %v4210_v7 = vpop.f32.mrb[52].mxu1 }
 0x151   :  { %v2455_v27 = vmax.f32 %v1601_v26, 0.0  ;;  %v1604_v12 = vadd.f32 %v4976_v48, %v1603_v20  ;;  %v3057_v14 = vadd.f32 %v3056_v50, %v3055_v37  ;;  %v3058_v26 = vsel %vm2655_vm3, %v2588_v62, 0.0  ;;  %v2160_v13 = vpop.f32.mrb[53].mxu1 }
 0x152   :  { %v2771_v36 = vadd.f32 %v2770_v18, %v2769_v17  ;;  %v2458_v57 = vmax.f32 %v1612_v30, 0.0  ;;  %v2776_v9 = vsel %vm2655_vm3, %v2457_v35, 0.0  ;;  %v2591_v18 = vmax.f32 %v2145_v56, 0.0  ;;  %v4211_v20 = vpop.f32.mrb[54].mxu1 }
 0x153   :  { %v2772_v32 = vsel %vm2655_vm3, %v2455_v27, 0.0  ;;  %v2456_v24 = vmax.f32 %v1604_v12, 0.0  ;;  %v2156_v17 = vadd.f32 %v5292_v47, %v4207_v25  ;;  %v3059_v4 = vadd.f32 %v3058_v26, %v3057_v14  ;;  %v2163_v27 = vpop.f32.mrb[55].mxu1 }
 0x154   :  { %v2773_v48 = vadd.f32 %v2772_v32, %v2771_v36  ;;  %v2778_v10 = vsel %vm2655_vm3, %v2458_v57, 0.0  ;;  %v2593_v35 = vmax.f32 %v2153_v5, 0.0  ;;  %v2148_v32 = vadd.f32 %v5292_v47, %v2147_v19 }
 0x155   :  { %v2774_v58 = vsel %vm2655_vm3, %v2456_v24, 0.0  ;;  %v4074_v60 = vpop.f32.mrb[60].mxu0  ;;  %v3061_v43 = vadd.f32 %v3060_v42, %v3059_v4  ;;  %v3070_v40 = vsel %vm2655_vm3, %v2591_v18, 0.0  ;;  %v2594_v49 = vmax.f32 %v2156_v17, 0.0 }
 0x156   :  { %v2775_v63 = vadd.f32 %v2774_v58, %v2773_v48  ;;  %v1625_v1 = vadd.f32 %v5292_v47, %v4074_v60  ;;  %v1616_v45 = vpop.f32.mrb[61].mxu0  ;;  %v2592_v57 = vmax.f32 %v2148_v32, 0.0  ;;  %v2161_v53 = vadd.f32 %v5292_v47, %v2160_v13 }
 0x157   :  { %v1617_v55 = vadd.f32 %v5292_v47, %v1616_v45  ;;  %v4075_v44 = vpop.f32.mrb[62].mxu0  ;;  %v5314_v56 = vadd.f32 %v3062_v34, %v3061_v43  ;;  %v2723_v58 = vrot.slane %v5235_v52, 1  ;;  %v3073_v19 = vsel %vm2655_vm3, %v2593_v35, 0.0 }
 0x158   :  { %v2777_v51 = vadd.f32 %v2776_v9, %v2775_v63  ;;  %v1628_v15 = vadd.f32 %v5292_v47, %v4075_v44  ;;  %v1619_v16 = vpop.f32.mrb[63].mxu0  ;;  %v2461_v30 = vmax.f32 %v1625_v1, 0.0  ;;  %v3071_v5 = vsel %vm2655_vm3, %v2592_v57, 0.0 }
 0x159   :  { %v2459_v21 = vmax.f32 %v1617_v55, 0.0  ;;  %v1620_v22 = vadd.f32 %v5292_v47, %v1619_v16  ;;  %v5320_v63 = vpop.f32.mrb[56].mxu1  ;;  %v2595_v9 = vmax.f32 %v2161_v53, 0.0  ;;  %v3075_v26 = vsel %vm2655_vm3, %v2594_v49, 0.0 }
 0x15a   :  { %v2779_v12 = vadd.f32 %v2778_v10, %v2777_v51  ;;  %v2462_v24 = vmax.f32 %v1628_v15, 0.0  ;;  %v2784_v60 = vsel %vm2655_vm3, %v2461_v30, 0.0  ;;  %v5325_v55 = vpop.f32.mrb[57].mxu1  ;;  %v3072_v13 = vadd.f32 %v3071_v5, %v3070_v40 }
 0x15b   :  { %v2780_v36 = vsel %vm2655_vm3, %v2459_v21, 0.0  ;;  %v2460_v28 = vmax.f32 %v1620_v22, 0.0  ;;  %v2169_v51 = vadd.f32 %v5292_v47, %v4210_v7  ;;  %v5329_v15 = vpop.f32.mrb[58].mxu1  ;;  %v2724_v30 = vadd.f32 %v2723_v58, %v5235_v52 }
 0x15c   :  { %v2781_v25 = vadd.f32 %v2780_v36, %v2779_v12  ;;  %v2786_v16 = vsel %vm2655_vm3, %v2462_v24, 0.0  ;;  %v5334_v21 = vpop.f32.mrb[59].mxu1  ;;  %v3074_v4 = vadd.f32 %v3073_v19, %v3072_v13  ;;  %v3077_v35 = vsel %vm2655_vm3, %v2595_v9, 0.0 }
 0x15d   :  { %v2782_v48 = vsel %vm2655_vm3, %v2460_v28, 0.0  ;;  %v4078_v50 = vpop.f32.mrb[64].mxu0  ;;  %v2597_v36 = vmax.f32 %v2169_v51, 0.0  ;;  %v2172_v43 = vadd.f32 %v5292_v47, %v4211_v20  ;;  %v2164_v49 = vadd.f32 %v5292_v47, %v2163_v27 }
 0x15e   :  { %v2783_v37 = vadd.f32 %v2782_v48, %v2781_v25  ;;  %v1632_v62 = vpop.f32.mrb[65].mxu0  ;;  %v1641_v1 = vadd.f32 %v5292_v47, %v4078_v50  ;;  %v3076_v28 = vadd.f32 %v3075_v26, %v3074_v4 }
 0x15f   :  { %v1633_v45 = vadd.f32 %v5292_v47, %v1632_v62  ;;  %v4079_v42 = vpop.f32.mrb[66].mxu0  ;;  %v2596_v19 = vmax.f32 %v2164_v49, 0.0  ;;  %v2598_v9 = vmax.f32 %v2172_v43, 0.0 }
 0x160   :  { %v2785_v44 = vadd.f32 %v2784_v60, %v2783_v37  ;;  %v1635_v14 = vpop.f32.mrb[67].mxu0  ;;  %v1644_v17 = vadd.f32 %v5292_v47, %v4079_v42  ;;  %v2465_v12 = vmax.f32 %v1641_v1, 0.0  ;;  %v3078_v53 = vadd.f32 %v3077_v35, %v3076_v28 }
 0x161   :  { %v2463_v18 = vmax.f32 %v1633_v45, 0.0  ;;  %v1636_v10 = vadd.f32 %v5292_v47, %v1635_v14  ;;  %v5343_v58 = vpop.f32.mrb[60].mxu1  ;;  %v3209_v60 = vmul.f32 0.00390625, %v2724_v30  ;;  %v3079_v51 = vsel %vm2655_vm3, %v2596_v19, 0.0 }
 0x162   :  { %v2787_v22 = vadd.f32 %v2786_v16, %v2785_v44  ;;  %v2466_v25 = vmax.f32 %v1644_v17, 0.0  ;;  %v2797_v37 = vsel %vm2655_vm3, %v2465_v12, 0.0  ;;  %v5347_v1 = vpop.f32.mrb[61].mxu1  ;;  %v3080_v12 = vadd.f32 %v3079_v51, %v3078_v53 }
 0x163   :  { %v2464_v34 = vmax.f32 %v1636_v10, 0.0  ;;  %v2794_v32 = vsel %vm2655_vm3, %v2463_v18, 0.0  ;;  %v5350_v44 = vpop.f32.mrb[62].mxu1  ;;  %v3083_v28 = vsel %vm2655_vm3, %v2598_v9, 0.0  ;;  %v3217_v43 = vpack.c.bf16 %v3209_v60, %v3209_v60 }
 0x164   :  { %v2788_v7 = vrot.slane %v2787_v22, 4  ;;  %v2799_v14 = vsel %vm2655_vm3, %v2466_v25, 0.0  ;;  %v5355_v16 = vpop.f32.mrb[63].mxu1 }
 0x165   :  { %v2795_v24 = vsel %vm2655_vm3, %v2464_v34, 0.0  ;;  %v4082_v40 = vpop.f32.mrb[68].mxu0 }
 0x166   :  { %v2789_v48 = vadd.f32 %v2788_v7, %v2787_v22  ;;  %v2796_v50 = vadd.f32 %v2795_v24, %v2794_v32  ;;  %v1657_v52 = vadd.f32 %v5292_v47, %v4082_v40  ;;  %v1648_v57 = vpop.f32.mrb[69].mxu0  ;;  %v3081_v22 = vsel %vm2655_vm3, %v2597_v36, 0.0 }
 0x167   :  { %v1649_v20 = vadd.f32 %v5292_v47, %v1648_v57  ;;  %v4083_v62 = vpop.f32.mrb[70].mxu0  ;;  %v3082_v24 = vadd.f32 %v3081_v22, %v3080_v12  ;;  %v2177_v40 = vadd.f32 %v5292_v47, %v5325_v55 }
 0x168   :  { %v2790_v45 = vrot.slane %v2789_v48, 2  ;;  %v2798_v42 = vadd.f32 %v2797_v37, %v2796_v50  ;;  %v1660_v27 = vadd.f32 %v5292_v47, %v4083_v62  ;;  %v1651_v5 = vpop.f32.mrb[71].mxu0  ;;  %v2469_v17 = vmax.f32 %v1657_v52, 0.0 }
 0x169   :  { %v2467_v26 = vmax.f32 %v1649_v20, 0.0  ;;  %v1652_v13 = vadd.f32 %v5292_v47, %v1651_v5  ;;  %v2185_v52 = vadd.f32 %v5292_v47, %v5320_v63  ;;  %v5366_v57 = vpop.f32.mrb[64].mxu1  ;;  %v2599_v20 = vmax.f32 %v2177_v40, 0.0 }
 0x16a   :  { %v2791_v18 = vadd.f32 %v2790_v45, %v2789_v48  ;;  %v2800_v10 = vadd.f32 %v2799_v14, %v2798_v42  ;;  %v2470_v7 = vmax.f32 %v1660_v27, 0.0  ;;  %v2805_v36 = vsel %vm2655_vm3, %v2469_v17, 0.0  ;;  %v5370_v19 = vpop.f32.mrb[65].mxu1 }
 0x16b   :  { %v2801_v4 = vsel %vm2655_vm3, %v2467_v26, 0.0  ;;  %v2468_v30 = vmax.f32 %v1652_v13, 0.0  ;;  %v3084_v62 = vadd.f32 %v3083_v28, %v3082_v24  ;;  %v5374_v9 = vpop.f32.mrb[66].mxu1  ;;  %v3085_v26 = vsel %vm2655_vm3, %v2599_v20, 0.0 }
 0x16c   :  { %v2792_v34 = vrot.slane %v2791_v18, 1  ;;  %v2802_v35 = vadd.f32 %v2801_v4, %v2800_v10  ;;  %v2807_v45 = vsel %vm2655_vm3, %v2470_v7, 0.0  ;;  %v2188_v13 = vadd.f32 %v5292_v47, %v5329_v15  ;;  %v5380_v51 = vpop.f32.mrb[67].mxu1 }
 0x16d   :  { %v2803_v32 = vsel %vm2655_vm3, %v2468_v30, 0.0  ;;  %v4086_v25 = vpop.f32.mrb[72].mxu0  ;;  %v2601_v22 = vmax.f32 %v2185_v52, 0.0  ;;  %v2193_v40 = vadd.f32 %v5292_v47, %v5347_v1 }
 0x16e   :  { %v2793_v49 = vadd.f32 %v2792_v34, %v2791_v18  ;;  %v2804_v48 = vadd.f32 %v2803_v32, %v2802_v35  ;;  %v1664_v50 = vpop.f32.mrb[73].mxu0  ;;  %v1673_v53 = vadd.f32 %v5292_v47, %v4086_v25  ;;  %v3243_v18 = vunpack.c.l.b16 %v3217_v43 }
 0x16f   :  { %v1665_v60 = vadd.f32 %v5292_v47, %v1664_v50  ;;  %v4087_v37 = vpop.f32.mrb[74].mxu0  ;;  %v3086_v34 = vadd.f32 %v3085_v26, %v3084_v62  ;;  %v2180_v32 = vadd.f32 %v5292_v47, %v5334_v21  ;;  %v2602_v24 = vmax.f32 %v2188_v13, 0.0 }
 0x170   :  { %v3210_v55 = vmul.f32 0.00390625, %v2793_v49  ;;  %v2806_v42 = vadd.f32 %v2805_v36, %v2804_v48  ;;  %v1676_v27 = vadd.f32 %v5292_v47, %v4087_v37  ;;  %v1667_v5 = vpop.f32.mrb[75].mxu0  ;;  %v2473_v4 = vmax.f32 %v1673_v53, 0.0 }
 0x171   :  { %v2471_v63 = vmax.f32 %v1665_v60, 0.0  ;;  %v1668_v14 = vadd.f32 %v5292_v47, %v1667_v5  ;;  %v2201_v43 = vadd.f32 %v5292_v47, %v5343_v58  ;;  %v2600_v52 = vmax.f32 %v2180_v32, 0.0  ;;  %v5394_v53 = vpop.f32.mrb[68].mxu1 }
 0x172   :  { %v3218_v17 = vpack.c.bf16 %v3210_v55, %v3210_v55  ;;  %v2808_v10 = vadd.f32 %v2807_v45, %v2806_v42  ;;  %v2474_v28 = vmax.f32 %v1676_v27, 0.0  ;;  %v2813_v21 = vsel %vm2655_vm3, %v2473_v4, 0.0  ;;  %v5399_v62 = vpop.f32.mrb[69].mxu1 }
 0x173   :  { %v2809_v30 = vsel %vm2655_vm3, %v2471_v63, 0.0  ;;  %v2472_v12 = vmax.f32 %v1668_v14, 0.0  ;;  %v3089_v58 = vsel %vm2655_vm3, %v2601_v22, 0.0  ;;  %v2605_v20 = vmax.f32 %v2201_v43, 0.0  ;;  %v5403_v5 = vpop.f32.mrb[70].mxu1 }
 0x174   :  { %v3244_v35 = vunpack.c.l.b16 %v3218_v17  ;;  %v2810_v7 = vadd.f32 %v2809_v30, %v2808_v10  ;;  %v3087_v42 = vsel %vm2655_vm3, %v2600_v52, 0.0  ;;  %v2603_v27 = vmax.f32 %v2193_v40, 0.0 }
 0x175   :  { %v2811_v25 = vsel %vm2655_vm3, %v2472_v12, 0.0  ;;  %v4090_v15 = vpop.f32.mrb[76].mxu0  ;;  %v2815_v63 = vsel %vm2655_vm3, %v2474_v28, 0.0  ;;  %v3088_v13 = vadd.f32 %v3087_v42, %v3086_v34  ;;  %v3091_v22 = vsel %vm2655_vm3, %v2602_v24, 0.0 }
 0x176   :  { %v5391_v49 = vsel %vm3251_vm4, %v3244_v35, %v3243_v18  ;;  %v2812_v36 = vadd.f32 %v2811_v25, %v2810_v7  ;;  %v1689_v48 = vadd.f32 %v5292_v47, %v4090_v15  ;;  %v1680_v50 = vpop.f32.mrb[77].mxu0  ;;  %v5407_v18 = vpop.f32.mrb[71].mxu1  ;;  %v2204_v4 = vadd.f32 %v5292_v47, %v5350_v44 }
 0x177   :  { %v1681_v60 = vadd.f32 %v5292_v47, %v1680_v50  ;;  %v4091_v37 = vpop.f32.mrb[78].mxu0  ;;  %v3090_v7 = vadd.f32 %v3089_v58, %v3088_v13  ;;  %v3097_v28 = vsel %vm2655_vm3, %v2605_v20, 0.0  ;;  %v3093_v25 = vsel %vm2655_vm3, %v2603_v27, 0.0 }
 0x178   :  { %v2814_v1 = vadd.f32 %v2813_v21, %v2812_v36  ;;  %v1692_v55 = vadd.f32 %v5292_v47, %v4091_v37  ;;  %v1683_v45 = vpop.f32.mrb[79].mxu0  ;;  %v2477_v17 = vmax.f32 %v1689_v48, 0.0  ;;  %v2196_v34 = vadd.f32 %v5292_v47, %v5355_v16 }
 0x179   :  { %v2475_v14 = vmax.f32 %v1681_v60, 0.0  ;;  %v1684_v26 = vadd.f32 %v5292_v47, %v1683_v45  ;;  %v3092_v24 = vadd.f32 %v3091_v22, %v3090_v7  ;;  %v2217_v44 = vadd.f32 %v5292_v47, %v5366_v57  ;;  %v5423_v60 = vpop.f32.mrb[72].mxu1 }
 0x17a   :  { %v2816_v10 = vadd.f32 %v2815_v63, %v2814_v1  ;;  %v2478_v12 = vmax.f32 %v1692_v55, 0.0  ;;  %v2209_v40 = vadd.f32 %v5292_v47, %v5370_v19  ;;  %v2606_v52 = vmax.f32 %v2204_v4, 0.0  ;;  %v5428_v57 = vpop.f32.mrb[73].mxu1 }
 0x17b   :  { %v2817_v30 = vsel %vm2655_vm3, %v2475_v14, 0.0  ;;  %v2476_v35 = vmax.f32 %v1684_v26, 0.0  ;;  %v2604_v21 = vmax.f32 %v2196_v34, 0.0  ;;  %v2821_v16 = vsel %vm2655_vm3, %v2477_v17, 0.0  ;;  %v5432_v63 = vpop.f32.mrb[74].mxu1 }
 0x17c   :  { %v2818_v32 = vadd.f32 %v2817_v30, %v2816_v10  ;;  %v2823_v37 = vsel %vm2655_vm3, %v2478_v12, 0.0  ;;  %v3094_v1 = vadd.f32 %v3093_v25, %v3092_v24  ;;  %v2607_v27 = vmax.f32 %v2209_v40, 0.0  ;;  %v5435_v10 = vpop.f32.mrb[75].mxu1 }
 0x17d   :  { %v2819_v15 = vsel %vm2655_vm3, %v2476_v35, 0.0  ;;  %v4094_v43 = vpop.f32.mrb[80].mxu0  ;;  %v3095_v42 = vsel %vm2655_vm3, %v2604_v21, 0.0  ;;  %v2609_v17 = vmax.f32 %v2217_v44, 0.0  ;;  %v3099_v30 = vsel %vm2655_vm3, %v2606_v52, 0.0 }
 0x17e   :  { %v2820_v36 = vadd.f32 %v2819_v15, %v2818_v32  ;;  %v1705_v48 = vadd.f32 %v5292_v47, %v4094_v43  ;;  %v1696_v50 = vpop.f32.mrb[81].mxu0  ;;  %v3096_v13 = vadd.f32 %v3095_v42, %v3094_v1  ;;  %v2220_v12 = vadd.f32 %v5292_v47, %v5374_v9 }
 0x17f   :  { %v1697_v58 = vadd.f32 %v5292_v47, %v1696_v50  ;;  %v4095_v20 = vpop.f32.mrb[82].mxu0  ;;  %v3101_v15 = vsel %vm2655_vm3, %v2607_v27, 0.0  ;;  %v2212_v43 = vadd.f32 %v5292_v47, %v5380_v51  ;;  %v2233_v24 = vadd.f32 %v5292_v47, %v5394_v53 }
 0x180   :  { %v2822_v55 = vadd.f32 %v2821_v16, %v2820_v36  ;;  %v1708_v19 = vadd.f32 %v5292_v47, %v4095_v20  ;;  %v1699_v45 = vpop.f32.mrb[83].mxu0  ;;  %v2481_v22 = vmax.f32 %v1705_v48, 0.0  ;;  %v3098_v25 = vadd.f32 %v3097_v28, %v3096_v13 }
 0x181   :  { %v2479_v14 = vmax.f32 %v1697_v58, 0.0  ;;  %v1700_v26 = vadd.f32 %v5292_v47, %v1699_v45  ;;  %v3105_v36 = vsel %vm2655_vm3, %v2609_v17, 0.0  ;;  %v2225_v48 = vadd.f32 %v5292_v47, %v5399_v62 }
 0x182   :  { %v2824_v4 = vadd.f32 %v2823_v37, %v2822_v55  ;;  %v2482_v7 = vmax.f32 %v1708_v19, 0.0  ;;  %v3100_v9 = vadd.f32 %v3099_v30, %v3098_v25  ;;  %v2610_v21 = vmax.f32 %v2220_v12, 0.0  ;;  %v5451_v37 = vpop.f32.mrb[76].mxu1 }
 0x183   :  { %v2825_v35 = vsel %vm2655_vm3, %v2479_v14, 0.0  ;;  %v2480_v32 = vmax.f32 %v1700_v26, 0.0  ;;  %v2608_v16 = vmax.f32 %v2212_v43, 0.0  ;;  %v2829_v51 = vsel %vm2655_vm3, %v2481_v22, 0.0  ;;  %v5455_v55 = vpop.f32.mrb[77].mxu1 }
 0x184   :  { %v2826_v34 = vadd.f32 %v2825_v35, %v2824_v4  ;;  %v3102_v20 = vadd.f32 %v3101_v15, %v3100_v9  ;;  %v2613_v1 = vmax.f32 %v2233_v24, 0.0  ;;  %v2831_v19 = vsel %vm2655_vm3, %v2482_v7, 0.0  ;;  %v5459_v14 = vpop.f32.mrb[78].mxu1 }
 0x185   :  { %v2827_v44 = vsel %vm2655_vm3, %v2480_v32, 0.0  ;;  %v4098_v40 = vpop.f32.mrb[84].mxu0  ;;  %v3103_v42 = vsel %vm2655_vm3, %v2608_v16, 0.0  ;;  %v2611_v27 = vmax.f32 %v2225_v48, 0.0  ;;  %v5463_v4 = vpop.f32.mrb[79].mxu1  ;;  %v3107_v35 = vsel %vm2655_vm3, %v2610_v21, 0.0 }
 0x186   :  { %v2828_v50 = vadd.f32 %v2827_v44, %v2826_v34  ;;  %v1721_v28 = vadd.f32 %v5292_v47, %v4098_v40  ;;  %v1712_v52 = vpop.f32.mrb[85].mxu0  ;;  %v3104_v22 = vadd.f32 %v3103_v42, %v3102_v20  ;;  %v2236_v7 = vadd.f32 %v5292_v47, %v5403_v5 }
 0x187   :  { %v1713_v53 = vadd.f32 %v5292_v47, %v1712_v52  ;;  %v4099_v58 = vpop.f32.mrb[86].mxu0  ;;  %v3113_v15 = vsel %vm2655_vm3, %v2613_v1, 0.0  ;;  %v3109_v24 = vsel %vm2655_vm3, %v2611_v27, 0.0  ;;  %v2228_v44 = vadd.f32 %v5292_v47, %v5407_v18 }
 0x188   :  { %v2830_v62 = vadd.f32 %v2829_v51, %v2828_v50  ;;  %v1715_v45 = vpop.f32.mrb[87].mxu0  ;;  %v1724_v13 = vadd.f32 %v5292_v47, %v4099_v58  ;;  %v2485_v30 = vmax.f32 %v1721_v28, 0.0  ;;  %v3106_v34 = vadd.f32 %v3105_v36, %v3104_v22 }
 0x189   :  { %v2483_v26 = vmax.f32 %v1713_v53, 0.0  ;;  %v1716_v17 = vadd.f32 %v5292_v47, %v1715_v45  ;;  %v2249_v40 = vadd.f32 %v5292_v47, %v5423_v60  ;;  %v2241_v28 = vadd.f32 %v5292_v47, %v5428_v57  ;;  %v5479_v53 = vpop.f32.mrb[80].mxu1 }
 0x18a   :  { %v2832_v12 = vadd.f32 %v2831_v19, %v2830_v62  ;;  %v2486_v9 = vmax.f32 %v1724_v13, 0.0  ;;  %v3108_v5 = vadd.f32 %v3107_v35, %v3106_v34  ;;  %v2614_v16 = vmax.f32 %v2236_v7, 0.0  ;;  %v5483_v19 = vpop.f32.mrb[81].mxu1 }
 0x18b   :  { %v2833_v32 = vsel %vm2655_vm3, %v2483_v26, 0.0  ;;  %v2484_v25 = vmax.f32 %v1716_v17, 0.0  ;;  %v2612_v51 = vmax.f32 %v2228_v44, 0.0  ;;  %v2837_v18 = vsel %vm2655_vm3, %v2485_v30, 0.0  ;;  %v5487_v26 = vpop.f32.mrb[82].mxu1 }
 0x18c   :  { %v2834_v43 = vadd.f32 %v2833_v32, %v2832_v12  ;;  %v3110_v20 = vadd.f32 %v3109_v24, %v3108_v5  ;;  %v2617_v1 = vmax.f32 %v2249_v40, 0.0  ;;  %v2615_v27 = vmax.f32 %v2241_v28, 0.0  ;;  %v5491_v12 = vpop.f32.mrb[83].mxu1 }
 0x18d   :  { %v2835_v48 = vsel %vm2655_vm3, %v2484_v25, 0.0  ;;  %v4102_v50 = vpop.f32.mrb[88].mxu0  ;;  %v3111_v42 = vsel %vm2655_vm3, %v2612_v51, 0.0  ;;  %v2839_v13 = vsel %vm2655_vm3, %v2486_v9, 0.0  ;;  %v3115_v32 = vsel %vm2655_vm3, %v2614_v16, 0.0 }
 0x18e   :  { %v2836_v36 = vadd.f32 %v2835_v48, %v2834_v43  ;;  %v1737_v52 = vadd.f32 %v5292_v47, %v4102_v50  ;;  %v1728_v21 = vpop.f32.mrb[89].mxu0  ;;  %v3112_v30 = vadd.f32 %v3111_v42, %v3110_v20  ;;  %v2252_v25 = vadd.f32 %v5292_v47, %v5432_v63 }
 0x18f   :  { %v1729_v60 = vadd.f32 %v5292_v47, %v1728_v21  ;;  %v4103_v58 = vpop.f32.mrb[90].mxu0  ;;  %v3121_v9 = vsel %vm2655_vm3, %v2617_v1, 0.0  ;;  %v3117_v48 = vsel %vm2655_vm3, %v2615_v27, 0.0  ;;  %v2244_v50 = vadd.f32 %v5292_v47, %v5435_v10 }
 0x190   :  { %v2838_v62 = vadd.f32 %v2837_v18, %v2836_v36  ;;  %v1740_v57 = vadd.f32 %v5292_v47, %v4103_v58  ;;  %v1731_v45 = vpop.f32.mrb[91].mxu0  ;;  %v2489_v35 = vmax.f32 %v1737_v52, 0.0  ;;  %v3114_v44 = vadd.f32 %v3113_v15, %v3112_v30 }
 0x191   :  { %v2487_v17 = vmax.f32 %v1729_v60, 0.0  ;;  %v1732_v22 = vadd.f32 %v5292_v47, %v1731_v45  ;;  %v2265_v63 = vadd.f32 %v5292_v47, %v5451_v37  ;;  %v2257_v52 = vadd.f32 %v5292_v47, %v5455_v55  ;;  %v5507_v60 = vpop.f32.mrb[84].mxu1 }
 0x192   :  { %v2840_v7 = vadd.f32 %v2839_v13, %v2838_v62  ;;  %v2490_v43 = vmax.f32 %v1740_v57, 0.0  ;;  %v3116_v36 = vadd.f32 %v3115_v32, %v3114_v44  ;;  %v2845_v15 = vsel %vm2655_vm3, %v2489_v35, 0.0  ;;  %v5512_v37 = vpop.f32.mrb[85].mxu1 }
 0x193   :  { %v2841_v34 = vsel %vm2655_vm3, %v2487_v17, 0.0  ;;  %v2488_v24 = vmax.f32 %v1732_v22, 0.0  ;;  %v2618_v51 = vmax.f32 %v2252_v25, 0.0  ;;  %v2616_v18 = vmax.f32 %v2244_v50, 0.0  ;;  %v5516_v13 = vpop.f32.mrb[86].mxu1 }
 0x194   :  { %v2842_v40 = vadd.f32 %v2841_v34, %v2840_v7  ;;  %v2847_v10 = vsel %vm2655_vm3, %v2490_v43, 0.0  ;;  %v3118_v62 = vadd.f32 %v3117_v48, %v3116_v36  ;;  %v2619_v27 = vmax.f32 %v2257_v52, 0.0  ;;  %v5519_v7 = vpop.f32.mrb[87].mxu1 }
 0x195   :  { %v2843_v5 = vsel %vm2655_vm3, %v2488_v24, 0.0  ;;  %v4106_v28 = vpop.f32.mrb[92].mxu0  ;;  %v3119_v42 = vsel %vm2655_vm3, %v2616_v18, 0.0  ;;  %v2621_v35 = vmax.f32 %v2265_v63, 0.0  ;;  %v3123_v25 = vsel %vm2655_vm3, %v2618_v51, 0.0 }
 0x196   :  { %v2844_v21 = vadd.f32 %v2843_v5, %v2842_v40  ;;  %v1744_v16 = vpop.f32.mrb[93].mxu0  ;;  %v1753_v58 = vadd.f32 %v5292_v47, %v4106_v28  ;;  %v3120_v30 = vadd.f32 %v3119_v42, %v3118_v62  ;;  %v2268_v34 = vadd.f32 %v5292_v47, %v5459_v14 }
 0x197   :  { %v1745_v20 = vadd.f32 %v5292_v47, %v1744_v16  ;;  %v4107_v1 = vpop.f32.mrb[94].mxu0  ;;  %v3125_v5 = vsel %vm2655_vm3, %v2619_v27, 0.0  ;;  %v2260_v28 = vadd.f32 %v5292_v47, %v5463_v4  ;;  %v3129_v52 = vsel %vm2655_vm3, %v2621_v35, 0.0 }
 0x198   :  { %v2846_v57 = vadd.f32 %v2845_v15, %v2844_v21  ;;  %v1756_v55 = vadd.f32 %v5292_v47, %v4107_v1  ;;  %v1747_v45 = vpop.f32.mrb[95].mxu0  ;;  %v2493_v43 = vmax.f32 %v1753_v58, 0.0  ;;  %v3122_v40 = vadd.f32 %v3121_v9, %v3120_v30 }
 0x199   :  { %v2491_v17 = vmax.f32 %v1745_v20, 0.0  ;;  %v1748_v22 = vadd.f32 %v5292_v47, %v1747_v45  ;;  %v2622_v16 = vmax.f32 %v2268_v34, 0.0  ;;  %v2620_v51 = vmax.f32 %v2260_v28, 0.0  ;;  %v5532_v18 = vpop.f32.mrb[88].mxu1 }
 0x19a   :  { %v2848_v32 = vadd.f32 %v2847_v10, %v2846_v57  ;;  %v2494_v50 = vmax.f32 %v1756_v55, 0.0  ;;  %v3124_v15 = vadd.f32 %v3123_v25, %v3122_v40  ;;  %v2273_v9 = vadd.f32 %v5292_v47, %v5483_v19  ;;  %v5537_v62 = vpop.f32.mrb[89].mxu1 }
 0x19b   :  { %v2849_v24 = vsel %vm2655_vm3, %v2491_v17, 0.0  ;;  %v2492_v44 = vmax.f32 %v1748_v22, 0.0  ;;  %v2853_v10 = vsel %vm2655_vm3, %v2493_v43, 0.0  ;;  %v3127_v19 = vsel %vm2655_vm3, %v2620_v51, 0.0  ;;  %v5542_v27 = vpop.f32.mrb[90].mxu1 }
 0x19c   :  { %v2850_v48 = vadd.f32 %v2849_v24, %v2848_v32  ;;  %v3126_v1 = vadd.f32 %v3125_v5, %v3124_v15  ;;  %v2855_v57 = vsel %vm2655_vm3, %v2494_v50, 0.0  ;;  %v2281_v35 = vadd.f32 %v5292_v47, %v5479_v53  ;;  %v5547_v32 = vpop.f32.mrb[91].mxu1 }
 0x19d   :  { %v2851_v36 = vsel %vm2655_vm3, %v2492_v44, 0.0  ;;  %v4110_v63 = vpop.f32.mrb[96].mxu0  ;;  %v3131_v34 = vsel %vm2655_vm3, %v2622_v16, 0.0  ;;  %v2623_v43 = vmax.f32 %v2273_v9, 0.0  ;;  %v2276_v28 = vadd.f32 %v5292_v47, %v5491_v12 }
 0x19e   :  { %v2852_v21 = vadd.f32 %v2851_v36, %v2850_v48  ;;  %v1760_v14 = vpop.f32.mrb[97].mxu0  ;;  %v1769_v58 = vadd.f32 %v5292_v47, %v4110_v63  ;;  %v3128_v30 = vadd.f32 %v3127_v19, %v3126_v1  ;;  %v2284_v48 = vadd.f32 %v5292_v47, %v5487_v26 }
 0x19f   :  { %v1761_v4 = vadd.f32 %v5292_v47, %v1760_v14  ;;  %v4111_v20 = vpop.f32.mrb[98].mxu0  ;;  %v2624_v9 = vmax.f32 %v2276_v28, 0.0 }
 0x1a0   :  { %v2854_v55 = vadd.f32 %v2853_v10, %v2852_v21  ;;  %v1772_v45 = vadd.f32 %v5292_v47, %v4111_v20  ;;  %v1763_v42 = vpop.f32.mrb[99].mxu0  ;;  %v2497_v24 = vmax.f32 %v1769_v58, 0.0  ;;  %v3130_v40 = vadd.f32 %v3129_v52, %v3128_v30 }
 0x1a1   :  { %v2495_v17 = vmax.f32 %v1761_v4, 0.0  ;;  %v1764_v22 = vadd.f32 %v5292_v47, %v1763_v42  ;;  %v2625_v21 = vmax.f32 %v2281_v35, 0.0  ;;  %v5559_v26 = vpop.f32.mrb[92].mxu1  ;;  %v3139_v4 = vsel %vm2655_vm3, %v2623_v43, 0.0 }
 0x1a2   :  { %v2856_v25 = vadd.f32 %v2855_v57, %v2854_v55  ;;  %v2498_v5 = vmax.f32 %v1772_v45, 0.0  ;;  %v5556_v15 = vadd.f32 %v3131_v34, %v3130_v40  ;;  %v2866_v10 = vsel %vm2655_vm3, %v2497_v24, 0.0  ;;  %v5564_v1 = vpop.f32.mrb[93].mxu1 }
 0x1a3   :  { %v2496_v44 = vmax.f32 %v1764_v22, 0.0  ;;  %v2863_v36 = vsel %vm2655_vm3, %v2495_v17, 0.0  ;;  %v2626_v20 = vmax.f32 %v2284_v48, 0.0  ;;  %v5568_v17 = vpop.f32.mrb[94].mxu1  ;;  %v3140_v35 = vsel %vm2655_vm3, %v2624_v9, 0.0 }
 0x1a4   :  { %v2857_v50 = vrot.slane %v2856_v25, 4  ;;  %v2868_v55 = vsel %vm2655_vm3, %v2498_v5, 0.0  ;;  %v5574_v34 = vpop.f32.mrb[95].mxu1  ;;  %v3142_v40 = vsel %vm2655_vm3, %v2625_v21, 0.0  ;;  %v3141_v5 = vadd.f32 %v3140_v35, %v3139_v4 }
 0x1a5   :  { %v2864_v53 = vsel %vm2655_vm3, %v2496_v44, 0.0  ;;  %v4114_v63 = vpop.f32.mrb[100].mxu0  ;;  %v2297_v21 = vadd.f32 %v5292_v47, %v5507_v60 }
 0x1a6   :  { %v2858_v14 = vadd.f32 %v2857_v50, %v2856_v25  ;;  %v2865_v16 = vadd.f32 %v2864_v53, %v2863_v36  ;;  %v1785_v52 = vadd.f32 %v5292_v47, %v4114_v63  ;;  %v1776_v51 = vpop.f32.mrb[101].mxu0  ;;  %v2289_v25 = vadd.f32 %v5292_v47, %v5512_v37 }
 0x1a7   :  { %v1777_v12 = vadd.f32 %v5292_v47, %v1776_v51  ;;  %v4115_v58 = vpop.f32.mrb[102].mxu0  ;;  %v3144_v63 = vsel %vm2655_vm3, %v2626_v20, 0.0  ;;  %v3143_v37 = vadd.f32 %v3142_v40, %v3141_v5  ;;  %v2300_v40 = vadd.f32 %v5292_v47, %v5516_v13 }
 0x1a8   :  { %v2859_v57 = vrot.slane %v2858_v14, 2  ;;  %v2867_v45 = vadd.f32 %v2866_v10, %v2865_v16  ;;  %v1788_v42 = vadd.f32 %v5292_v47, %v4115_v58  ;;  %v1779_v19 = vpop.f32.mrb[103].mxu0  ;;  %v2501_v24 = vmax.f32 %v1785_v52, 0.0 }
 0x1a9   :  { %v2499_v22 = vmax.f32 %v1777_v12, 0.0  ;;  %v1780_v30 = vadd.f32 %v5292_v47, %v1779_v19  ;;  %v2627_v9 = vmax.f32 %v2289_v25, 0.0  ;;  %v5583_v58 = vpop.f32.mrb[96].mxu1  ;;  %v2630_v13 = vmax.f32 %v2300_v40, 0.0 }
 0x1aa   :  { %v2860_v43 = vadd.f32 %v2859_v57, %v2858_v14  ;;  %v2869_v44 = vadd.f32 %v2868_v55, %v2867_v45  ;;  %v2502_v53 = vmax.f32 %v1788_v42, 0.0  ;;  %v2874_v14 = vsel %vm2655_vm3, %v2501_v24, 0.0  ;;  %v5588_v42 = vpop.f32.mrb[97].mxu1 }
 0x1ab   :  { %v2870_v48 = vsel %vm2655_vm3, %v2499_v22, 0.0  ;;  %v2500_v50 = vmax.f32 %v1780_v30, 0.0  ;;  %v3145_v55 = vadd.f32 %v3144_v63, %v3143_v37  ;;  %v3146_v45 = vsel %vm2655_vm3, %v2627_v9, 0.0  ;;  %v5592_v60 = vpop.f32.mrb[98].mxu1 }
 0x1ac   :  { %v2861_v28 = vrot.slane %v2860_v43, 1  ;;  %v2871_v36 = vadd.f32 %v2870_v48, %v2869_v44  ;;  %v2876_v22 = vsel %vm2655_vm3, %v2502_v53, 0.0  ;;  %v5597_v48 = vpop.f32.mrb[99].mxu1  ;;  %v2629_v63 = vmax.f32 %v2297_v21, 0.0 }
 0x1ad   :  { %v2872_v16 = vsel %vm2655_vm3, %v2500_v50, 0.0  ;;  %v4118_v51 = vpop.f32.mrb[104].mxu0  ;;  %v3147_v44 = vadd.f32 %v3146_v45, %v3145_v55  ;;  %v2292_v9 = vadd.f32 %v5292_v47, %v5519_v7 }
 0x1ae   :  { %v2862_v10 = vadd.f32 %v2861_v28, %v2860_v43  ;;  %v2873_v52 = vadd.f32 %v2872_v16, %v2871_v36  ;;  %v1792_v12 = vpop.f32.mrb[105].mxu0  ;;  %v1801_v4 = vadd.f32 %v5292_v47, %v4118_v51 }
 0x1af   :  { %v1793_v57 = vadd.f32 %v5292_v47, %v1792_v12  ;;  %v4119_v20 = vpop.f32.mrb[106].mxu0 }
 0x1b0   :  { %v3211_v19 = vmul.f32 0.00390625, %v2862_v10  ;;  %v2875_v30 = vadd.f32 %v2874_v14, %v2873_v52  ;;  %v1804_v35 = vadd.f32 %v5292_v47, %v4119_v20  ;;  %v1795_v25 = vpop.f32.mrb[107].mxu0  ;;  %v2505_v28 = vmax.f32 %v1801_v4, 0.0 }
 0x1b1   :  { %v2503_v43 = vmax.f32 %v1793_v57, 0.0  ;;  %v1796_v24 = vadd.f32 %v5292_v47, %v1795_v25  ;;  %v2313_v52 = vadd.f32 %v5292_v47, %v5532_v18  ;;  %v2628_v20 = vmax.f32 %v2292_v9, 0.0  ;;  %v5609_v55 = vpop.f32.mrb[100].mxu1 }
 0x1b2   :  { %v3219_v50 = vpack.c.bf16 %v3211_v19, %v3211_v19  ;;  %v2877_v5 = vadd.f32 %v2876_v22, %v2875_v30  ;;  %v2506_v37 = vmax.f32 %v1804_v35, 0.0  ;;  %v2882_v45 = vsel %vm2655_vm3, %v2505_v28, 0.0  ;;  %v5616_v30 = vpop.f32.mrb[101].mxu1 }
 0x1b3   :  { %v2878_v36 = vsel %vm2655_vm3, %v2503_v43, 0.0  ;;  %v2504_v53 = vmax.f32 %v1796_v24, 0.0  ;;  %v3150_v22 = vsel %vm2655_vm3, %v2629_v63, 0.0  ;;  %v2305_v18 = vadd.f32 %v5292_v47, %v5537_v62  ;;  %v5621_v40 = vpop.f32.mrb[102].mxu1 }
 0x1b4   :  { %v3245_v16 = vunpack.c.l.b16 %v3219_v50  ;;  %v2879_v51 = vadd.f32 %v2878_v36, %v2877_v5  ;;  %v3148_v24 = vsel %vm2655_vm3, %v2628_v20, 0.0  ;;  %v3152_v28 = vsel %vm2655_vm3, %v2630_v13, 0.0 }
 0x1b5   :  { %v2880_v10 = vsel %vm2655_vm3, %v2504_v53, 0.0  ;;  %v4122_v14 = vpop.f32.mrb[108].mxu0  ;;  %v3149_v36 = vadd.f32 %v3148_v24, %v3147_v44  ;;  %v5625_v53 = vpop.f32.mrb[103].mxu1  ;;  %v5634_v44 = vld [vmem:[%s5943_s5] ss:$0 sm:$0xff] }
 0x1b6   :  { %v5606_v12 = vsel %vm3253_vm5, %v3245_v16, %v5391_v49  ;;  %v2881_v4 = vadd.f32 %v2880_v10, %v2879_v51  ;;  %v1817_v57 = vadd.f32 %v5292_v47, %v4122_v14  ;;  %v1808_v21 = vpop.f32.mrb[109].mxu0  ;;  %v2884_v49 = vsel %vm2655_vm3, %v2506_v37, 0.0 }
 0x1b7   :  { %v1809_v7 = vadd.f32 %v5292_v47, %v1808_v21  ;;  %v4123_v19 = vpop.f32.mrb[110].mxu0  ;;  %v2633_v16 = vmax.f32 %v2313_v52, 0.0  ;;  %v2631_v51 = vmax.f32 %v2305_v18, 0.0  ;;  %v3151_v10 = vadd.f32 %v3150_v22, %v3149_v36 }
 0x1b8   :  { %v2883_v35 = vadd.f32 %v2882_v45, %v2881_v4  ;;  %v1820_v25 = vadd.f32 %v5292_v47, %v4123_v19  ;;  %v1811_v43 = vpop.f32.mrb[111].mxu0  ;;  %v2509_v62 = vmax.f32 %v1817_v57, 0.0  ;;  %v2316_v14 = vadd.f32 %v5292_v47, %v5542_v27 }
 0x1b9   :  { %v2507_v50 = vmax.f32 %v1809_v7, 0.0  ;;  %v1812_v5 = vadd.f32 %v5292_v47, %v1811_v43  ;;  %v3154_v20 = vsel %vm2655_vm3, %v2631_v51, 0.0  ;;  %v2308_v13 = vadd.f32 %v5634_v44, %v5547_v32 }
 0x1ba   :  { %v2885_v63 = vadd.f32 %v2884_v49, %v2883_v35  ;;  %v2510_v21 = vmax.f32 %v1820_v25, 0.0  ;;  %v3153_v45 = vadd.f32 %v3152_v28, %v3151_v10  ;;  %v2634_v7 = vmax.f32 %v2316_v14, 0.0  ;;  %v5644_v35 = vpop.f32.mrb[104].mxu1 }
 0x1bb   :  { %v2886_v37 = vsel %vm2655_vm3, %v2507_v50, 0.0  ;;  %v2508_v9 = vmax.f32 %v1812_v5, 0.0  ;;  %v2329_v47 = vadd.f32 %v5634_v44, %v5559_v26  ;;  %v2632_v18 = vmax.f32 %v2308_v13, 0.0  ;;  %v5649_v5 = vpop.f32.mrb[105].mxu1 }
 0x1bc   :  { %v2887_v4 = vadd.f32 %v2886_v37, %v2885_v63  ;;  %v2321_v49 = vadd.f32 %v5634_v44, %v5564_v1  ;;  %v2890_v32 = vsel %vm2655_vm3, %v2509_v62, 0.0  ;;  %v3158_v24 = vsel %vm2655_vm3, %v2633_v16, 0.0  ;;  %v5654_v51 = vpop.f32.mrb[106].mxu1 }
 0x1bd   :  { %v2888_v52 = vsel %vm2655_vm3, %v2508_v9, 0.0  ;;  %v4126_v57 = vpop.f32.mrb[112].mxu0  ;;  %v3155_v50 = vadd.f32 %v3154_v20, %v3153_v45  ;;  %v2892_v26 = vsel %vm2655_vm3, %v2510_v21, 0.0  ;;  %v3156_v1 = vsel %vm2655_vm3, %v2632_v18, 0.0  ;;  %v5658_v16 = vpop.f32.mrb[107].mxu1 }
 0x1be   :  { %v2889_v27 = vadd.f32 %v2888_v52, %v2887_v4  ;;  %v1833_v19 = vadd.f32 %v5634_v44, %v4126_v57  ;;  %v1824_v22 = vpop.f32.mrb[113].mxu0  ;;  %v3160_v9 = vsel %vm2655_vm3, %v2634_v7, 0.0  ;;  %v2637_v20 = vmax.f32 %v2329_v47, 0.0 }
 0x1bf   :  { %v1825_v25 = vadd.f32 %v5634_v44, %v1824_v22  ;;  %v4127_v43 = vpop.f32.mrb[114].mxu0  ;;  %v3157_v10 = vadd.f32 %v3156_v1, %v3155_v50  ;;  %v2635_v21 = vmax.f32 %v2321_v49, 0.0  ;;  %v2332_v45 = vadd.f32 %v5634_v44, %v5568_v17 }
 0x1c0   :  { %v2891_v28 = vadd.f32 %v2890_v32, %v2889_v27  ;;  %v1836_v36 = vadd.f32 %v5634_v44, %v4127_v43  ;;  %v1827_v63 = vpop.f32.mrb[115].mxu0  ;;  %v2513_v14 = vmax.f32 %v1833_v19, 0.0  ;;  %v2324_v7 = vadd.f32 %v5634_v44, %v5574_v34 }
 0x1c1   :  { %v2511_v37 = vmax.f32 %v1825_v25, 0.0  ;;  %v1828_v62 = vadd.f32 %v5634_v44, %v1827_v63  ;;  %v3159_v57 = vadd.f32 %v3158_v24, %v3157_v10  ;;  %v3162_v18 = vsel %vm2655_vm3, %v2635_v21, 0.0 }
 0x1c2   :  { %v2893_v4 = vadd.f32 %v2892_v26, %v2891_v28  ;;  %v2514_v22 = vmax.f32 %v1836_v36, 0.0  ;;  %v2638_v47 = vmax.f32 %v2332_v45, 0.0  ;;  %v2345_v49 = vadd.f32 %v5634_v44, %v5583_v58  ;;  %v5672_v28 = vpop.f32.mrb[108].mxu1 }
 0x1c3   :  { %v2894_v13 = vsel %vm2655_vm3, %v2511_v37, 0.0  ;;  %v2512_v52 = vmax.f32 %v1828_v62, 0.0  ;;  %v3161_v25 = vadd.f32 %v3160_v9, %v3159_v57  ;;  %v2636_v17 = vmax.f32 %v2324_v7, 0.0  ;;  %v5677_v62 = vpop.f32.mrb[109].mxu1 }
 0x1c4   :  { %v2895_v27 = vadd.f32 %v2894_v13, %v2893_v4  ;;  %v2337_v26 = vadd.f32 %v5634_v44, %v5588_v42  ;;  %v2898_v34 = vsel %vm2655_vm3, %v2513_v14, 0.0  ;;  %v3166_v1 = vsel %vm2655_vm3, %v2637_v20, 0.0  ;;  %v5682_v21 = vpop.f32.mrb[110].mxu1 }
 0x1c5   :  { %v2896_v32 = vsel %vm2655_vm3, %v2512_v52, 0.0  ;;  %v4130_v19 = vpop.f32.mrb[116].mxu0  ;;  %v3163_v37 = vadd.f32 %v3162_v18, %v3161_v25  ;;  %v2900_v58 = vsel %vm2655_vm3, %v2514_v22, 0.0  ;;  %v3164_v42 = vsel %vm2655_vm3, %v2636_v17, 0.0  ;;  %v5686_v20 = vpop.f32.mrb[111].mxu1 }
 0x1c6   :  { %v2897_v43 = vadd.f32 %v2896_v32, %v2895_v27  ;;  %v1849_v24 = vadd.f32 %v5634_v44, %v4130_v19  ;;  %v1840_v50 = vpop.f32.mrb[117].mxu0  ;;  %v3168_v52 = vsel %vm2655_vm3, %v2638_v47, 0.0  ;;  %v2641_v18 = vmax.f32 %v2345_v49, 0.0 }
 0x1c7   :  { %v1841_v36 = vadd.f32 %v5634_v44, %v1840_v50  ;;  %v4131_v63 = vpop.f32.mrb[118].mxu0  ;;  %v3165_v57 = vadd.f32 %v3164_v42, %v3163_v37  ;;  %v2639_v22 = vmax.f32 %v2337_v26, 0.0  ;;  %v2348_v25 = vadd.f32 %v5634_v44, %v5592_v60 }
 0x1c8   :  { %v2899_v9 = vadd.f32 %v2898_v34, %v2897_v43  ;;  %v1852_v10 = vadd.f32 %v5634_v44, %v4131_v63  ;;  %v1843_v4 = vpop.f32.mrb[119].mxu0  ;;  %v2517_v45 = vmax.f32 %v1849_v24, 0.0  ;;  %v2340_v47 = vadd.f32 %v5634_v44, %v5597_v48 }
 0x1c9   :  { %v2515_v13 = vmax.f32 %v1841_v36, 0.0  ;;  %v1844_v14 = vadd.f32 %v5634_v44, %v1843_v4  ;;  %v3167_v19 = vadd.f32 %v3166_v1, %v3165_v57  ;;  %v3170_v17 = vsel %vm2655_vm3, %v2639_v22, 0.0 }
 0x1ca   :  { %v2901_v27 = vadd.f32 %v2900_v58, %v2899_v9  ;;  %v2518_v50 = vmax.f32 %v1852_v10, 0.0  ;;  %v2642_v49 = vmax.f32 %v2348_v25, 0.0  ;;  %v2361_v26 = vadd.f32 %v5634_v44, %v5609_v55 }
 0x1cb   :  { %v2902_v7 = vsel %vm2655_vm3, %v2515_v13, 0.0  ;;  %v2516_v32 = vmax.f32 %v1844_v14, 0.0  ;;  %v3169_v36 = vadd.f32 %v3168_v52, %v3167_v19  ;;  %v2640_v60 = vmax.f32 %v2340_v47, 0.0 }
 0x1cc   :  { %v2903_v43 = vadd.f32 %v2902_v7, %v2901_v27  ;;  %v2353_v58 = vadd.f32 %v5634_v44, %v5616_v30  ;;  %v2906_v9 = vsel %vm2655_vm3, %v2517_v45, 0.0  ;;  %v3174_v4 = vsel %vm2655_vm3, %v2641_v18, 0.0 }
 0x1cd   :  { %v2904_v34 = vsel %vm2655_vm3, %v2516_v32, 0.0  ;;  %v4134_v24 = vpop.f32.mrb[120].mxu0  ;;  %v3171_v42 = vadd.f32 %v3170_v17, %v3169_v36  ;;  %v2908_v13 = vsel %vm2655_vm3, %v2518_v50, 0.0  ;;  %v3172_v57 = vsel %vm2655_vm3, %v2640_v60, 0.0 }
 0x1ce   :  { %v2905_v63 = vadd.f32 %v2904_v34, %v2903_v43  ;;  %v1865_v1 = vadd.f32 %v5634_v44, %v4134_v24  ;;  %v1856_v37 = vpop.f32.mrb[121].mxu0  ;;  %v3176_v30 = vsel %vm2655_vm3, %v2642_v49, 0.0  ;;  %v2645_v19 = vmax.f32 %v2361_v26, 0.0 }
 0x1cf   :  { %v1857_v48 = vadd.f32 %v5634_v44, %v1856_v37  ;;  %v4135_v10 = vpop.f32.mrb[122].mxu0  ;;  %v3173_v45 = vadd.f32 %v3172_v57, %v3171_v42  ;;  %v2643_v25 = vmax.f32 %v2353_v58, 0.0  ;;  %v2364_v17 = vadd.f32 %v5634_v44, %v5621_v40 }
 0x1d0   :  { %v2907_v14 = vadd.f32 %v2906_v9, %v2905_v63  ;;  %v1868_v55 = vadd.f32 %v5634_v44, %v4135_v10  ;;  %v1859_v52 = vpop.f32.mrb[123].mxu0  ;;  %v2521_v7 = vmax.f32 %v1865_v1, 0.0  ;;  %v2356_v36 = vadd.f32 %v5634_v44, %v5625_v53 }
 0x1d1   :  { %v2519_v27 = vmax.f32 %v1857_v48, 0.0  ;;  %v1860_v22 = vadd.f32 %v5634_v44, %v1859_v52  ;;  %v3175_v50 = vadd.f32 %v3174_v4, %v3173_v45  ;;  %v3178_v24 = vsel %vm2655_vm3, %v2643_v25, 0.0 }
 0x1d2   :  { %v2909_v32 = vadd.f32 %v2908_v13, %v2907_v14  ;;  %v2522_v34 = vmax.f32 %v1868_v55, 0.0  ;;  %v2646_v26 = vmax.f32 %v2364_v17, 0.0  ;;  %v2644_v9 = vmax.f32 %v2356_v36, 0.0 }
 0x1d3   :  { %v2910_v18 = vsel %vm2655_vm3, %v2519_v27, 0.0  ;;  %v2520_v43 = vmax.f32 %v1860_v22, 0.0  ;;  %v3177_v1 = vadd.f32 %v3176_v30, %v3175_v50  ;;  %v2369_v40 = vadd.f32 %v5634_v44, %v5649_v5 }
 0x1d4   :  { %v2911_v47 = vadd.f32 %v2910_v18, %v2909_v32  ;;  %v2914_v48 = vsel %vm2655_vm3, %v2521_v7, 0.0  ;;  %v3182_v53 = vsel %vm2655_vm3, %v2645_v19, 0.0  ;;  %v2916_v13 = vsel %vm2655_vm3, %v2522_v34, 0.0 }
 0x1d5   :  { %v2912_v49 = vsel %vm2655_vm3, %v2520_v43, 0.0  ;;  %v4138_v63 = vpop.f32.mrb[124].mxu0  ;;  %v3179_v42 = vadd.f32 %v3178_v24, %v3177_v1  ;;  %v3180_v52 = vsel %vm2655_vm3, %v2644_v9, 0.0  ;;  %v2377_v57 = vadd.f32 %v5634_v44, %v5644_v35 }
 0x1d6   :  { %v2913_v37 = vadd.f32 %v2912_v49, %v2911_v47  ;;  %v1881_v60 = vadd.f32 %v5634_v44, %v4138_v63  ;;  %v1872_v58 = vpop.f32.mrb[125].mxu0  ;;  %v3184_v32 = vsel %vm2655_vm3, %v2646_v26, 0.0  ;;  %v2647_v19 = vmax.f32 %v2369_v40, 0.0 }
 0x1d7   :  { %v1873_v10 = vadd.f32 %v5634_v44, %v1872_v58  ;;  %v4139_v4 = vpop.f32.mrb[126].mxu0  ;;  %v3181_v30 = vadd.f32 %v3180_v52, %v3179_v42  ;;  %v2380_v50 = vadd.f32 %v5634_v44, %v5654_v51  ;;  %v2649_v35 = vmax.f32 %v2377_v57, 0.0 }
 0x1d8   :  { %v2915_v14 = vadd.f32 %v2914_v48, %v2913_v37  ;;  %v1875_v55 = vpop.f32.mrb[127].mxu0  ;;  %v1884_v5 = vadd.f32 %v5634_v44, %v4139_v4  ;;  %v2525_v45 = vmax.f32 %v1881_v60, 0.0  ;;  %v3186_v47 = vsel %vm2655_vm3, %v2647_v19, 0.0 }
 0x1d9   :  { %v2523_v27 = vmax.f32 %v1873_v10, 0.0  ;;  %v1876_v22 = vadd.f32 %v5634_v44, %v1875_v55  ;;  %v3183_v43 = vadd.f32 %v3182_v53, %v3181_v30  ;;  %v2372_v34 = vadd.f32 %v5634_v44, %v5658_v16 }
 0x1da   :  { %v2917_v7 = vadd.f32 %v2916_v13, %v2915_v14  ;;  %v2526_v24 = vmax.f32 %v1884_v5, 0.0  ;;  %v2650_v37 = vmax.f32 %v2380_v50, 0.0  ;;  %v2385_v58 = vadd.f32 %v5634_v44, %v5677_v62 }
 0x1db   :  { %v2918_v25 = vsel %vm2655_vm3, %v2523_v27, 0.0  ;;  %v2524_v18 = vmax.f32 %v1876_v22, 0.0  ;;  %v3185_v63 = vadd.f32 %v3184_v32, %v3183_v43  ;;  %v2648_v60 = vmax.f32 %v2372_v34, 0.0 }
 0x1dc   :  { %v2919_v17 = vadd.f32 %v2918_v25, %v2917_v7  ;;  %v2922_v51 = vsel %vm2655_vm3, %v2525_v45, 0.0  ;;  %v3190_v42 = vsel %vm2655_vm3, %v2649_v35, 0.0  ;;  %v2924_v14 = vsel %vm2655_vm3, %v2526_v24, 0.0 }
 0x1dd   :  { %v2920_v36 = vsel %vm2655_vm3, %v2524_v18, 0.0  ;;  %v4142_v49 = vpop.f32.mrb[128].mxu0  ;;  %v3187_v16 = vadd.f32 %v3186_v47, %v3185_v63  ;;  %v3188_v13 = vsel %vm2655_vm3, %v2648_v60, 0.0  ;;  %v3192_v27 = vsel %vm2655_vm3, %v2650_v37, 0.0 }
 0x1de   :  { %v2921_v1 = vadd.f32 %v2920_v36, %v2919_v17  ;;  %v1888_v26 = vpop.f32.mrb[129].mxu0  ;;  %v1897_v9 = vadd.f32 %v5634_v44, %v4142_v49  ;;  %v2393_v5 = vadd.f32 %v5634_v44, %v5672_v28  ;;  %v2651_v22 = vmax.f32 %v2385_v58, 0.0 }
 0x1df   :  { %v1889_v40 = vadd.f32 %v5634_v44, %v1888_v26  ;;  %v4143_v48 = vpop.f32.mrb[130].mxu0  ;;  %v3189_v52 = vadd.f32 %v3188_v13, %v3187_v16  ;;  %v2396_v18 = vadd.f32 %v5634_v44, %v5682_v21  ;;  %v2388_v43 = vadd.f32 %v5634_v44, %v5686_v20 }
 0x1e0   :  { %v2923_v10 = vadd.f32 %v2922_v51, %v2921_v1  ;;  %v1900_v4 = vadd.f32 %v5634_v44, %v4143_v48  ;;  %v1891_v53 = vpop.f32.mrb[131].mxu0  ;;  %v2529_v30 = vmax.f32 %v1897_v9, 0.0  ;;  %v3194_v25 = vsel %vm2655_vm3, %v2651_v22, 0.0 }
 0x1e1   :  { %v2527_v55 = vmax.f32 %v1889_v40, 0.0  ;;  %v1892_v62 = vadd.f32 %v5634_v44, %v1891_v53  ;;  %v3191_v32 = vadd.f32 %v3190_v42, %v3189_v52  ;;  %v2653_v36 = vmax.f32 %v2393_v5, 0.0 }
 0x1e2   :  { %v2925_v57 = vadd.f32 %v2924_v14, %v2923_v10  ;;  %v2530_v45 = vmax.f32 %v1900_v4, 0.0  ;;  %v2652_v49 = vmax.f32 %v2388_v43, 0.0  ;;  %v2935_v21 = vsel %vm2655_vm3, %v2529_v30, 0.0 }
 0x1e3   :  { %v2528_v7 = vmax.f32 %v1892_v62, 0.0  ;;  %v2932_v50 = vsel %vm2655_vm3, %v2527_v55, 0.0  ;;  %v3193_v28 = vadd.f32 %v3192_v27, %v3191_v32  ;;  %v2654_v9 = vmax.f32 %v2396_v18, 0.0 }
 0x1e4   :  { %v2926_v19 = vrot.slane %v2925_v57, 4  ;;  %v2937_v60 = vsel %vm2655_vm3, %v2530_v45, 0.0  ;;  %v3196_v10 = vsel %vm2655_vm3, %v2652_v49, 0.0  ;;  %v3198_v42 = vsel %vm2655_vm3, %v2653_v36, 0.0 }
 0x1e5   :  { %v2933_v17 = vsel %vm2655_vm3, %v2528_v7, 0.0  ;;  %v4146_v35 = vpop.f32.mrb[132].mxu0  ;;  %v3195_v26 = vadd.f32 %v3194_v25, %v3193_v28  ;;  %v3200_v27 = vsel %vm2655_vm3, %v2654_v9, 0.0 }
 0x1e6   :  { %v2927_v47 = vadd.f32 %v2926_v19, %v2925_v57  ;;  %v2934_v34 = vadd.f32 %v2933_v17, %v2932_v50  ;;  %v1904_v24 = vpop.f32.mrb[133].mxu0  ;;  %v1913_v63 = vadd.f32 %v5634_v44, %v4146_v35 }
 0x1e7   :  { %v1905_v20 = vadd.f32 %v5634_v44, %v1904_v24  ;;  %v4147_v1 = vpop.f32.mrb[134].mxu0  ;;  %v3197_v62 = vadd.f32 %v3196_v10, %v3195_v26 }
 0x1e8   :  { %v2928_v37 = vrot.slane %v2927_v47, 2  ;;  %v2936_v58 = vadd.f32 %v2935_v21, %v2934_v34  ;;  %v1907_v51 = vpop.f32.mrb[135].mxu0  ;;  %v1916_v48 = vadd.f32 %v5634_v44, %v4147_v1  ;;  %v2533_v13 = vmax.f32 %v1913_v63, 0.0 }
 0x1e9   :  { %v2531_v40 = vmax.f32 %v1905_v20, 0.0  ;;  %v1908_v16 = vadd.f32 %v5634_v44, %v1907_v51  ;;  %v3199_v45 = vadd.f32 %v3198_v42, %v3197_v62 }
 0x1ea   :  { %v2929_v4 = vadd.f32 %v2928_v37, %v2927_v47  ;;  %v2938_v53 = vadd.f32 %v2937_v60, %v2936_v58  ;;  %v2534_v5 = vmax.f32 %v1916_v48, 0.0  ;;  %v2943_v25 = vsel %vm2655_vm3, %v2533_v13, 0.0 }
 0x1eb   :  { %v2939_v14 = vsel %vm2655_vm3, %v2531_v40, 0.0  ;;  %v2532_v55 = vmax.f32 %v1908_v16, 0.0  ;;  %v5771_v17 = vadd.f32 %v3200_v27, %v3199_v45  ;;  %v1953_v27 = vadd.f32 %v5634_v44, %v5039_v38 }
 0x1ec   :  { %v2930_v52 = vrot.slane %v2929_v4, 1  ;;  %v2940_v57 = vadd.f32 %v2939_v14, %v2938_v53  ;;  %v2945_v34 = vsel %vm2655_vm3, %v2534_v5, 0.0  ;;  %v1964_v38 = vadd.f32 %v5634_v44, %v5041_v41 }
 0x1ed   :  { %v2941_v22 = vsel %vm2655_vm3, %v2532_v55, 0.0  ;;  %v4150_v30 = vpop.f32.mrb[136].mxu0 }
 0x1ee   :  { %v2931_v7 = vadd.f32 %v2930_v52, %v2929_v4  ;;  %v2942_v32 = vadd.f32 %v2941_v22, %v2940_v57  ;;  %v1920_v19 = vpop.f32.mrb[137].mxu0  ;;  %v1929_v18 = vadd.f32 %v5634_v44, %v4150_v30 }
 0x1ef   :  { %v1921_v43 = vadd.f32 %v5634_v44, %v1920_v19  ;;  %v4151_v50 = vpop.f32.mrb[138].mxu0 }
 0x1f0   :  { %v3212_v35 = vmul.f32 0.00390625, %v2931_v7  ;;  %v2944_v28 = vadd.f32 %v2943_v25, %v2942_v32  ;;  %v1923_v47 = vpop.f32.mrb[139].mxu0  ;;  %v1932_v36 = vadd.f32 %v5634_v44, %v4151_v50  ;;  %v2537_v20 = vmax.f32 %v1929_v18, 0.0 }
 0x1f1   :  { %v2535_v24 = vmax.f32 %v1921_v43, 0.0  ;;  %v1924_v49 = vadd.f32 %v5634_v44, %v1923_v47  ;;  %v1956_v7 = vadd.f32 %v5634_v44, %v5046_v46  ;;  %v1961_v18 = vadd.f32 %v5634_v44, %v5028_v31 }
 0x1f2   :  { %v3220_v21 = vpack.c.bf16 %v3212_v35, %v3212_v35  ;;  %v2946_v63 = vadd.f32 %v2945_v34, %v2944_v28  ;;  %v2538_v58 = vmax.f32 %v1932_v36, 0.0  ;;  %v2951_v10 = vsel %vm2655_vm3, %v2537_v20, 0.0 }
 0x1f3   :  { %v2947_v1 = vsel %vm2655_vm3, %v2535_v24, 0.0  ;;  %v2536_v26 = vmax.f32 %v1924_v49, 0.0  ;;  %v2543_v43 = vmax.f32 %v1953_v27, 0.0  ;;  %v2544_v28 = vmax.f32 %v1956_v7, 0.0 }
 0x1f4   :  { %v3246_v37 = vunpack.c.l.b16 %v3220_v21  ;;  %v2948_v60 = vadd.f32 %v2947_v1, %v2946_v63  ;;  %v2953_v55 = vsel %vm2655_vm3, %v2538_v58, 0.0  ;;  %v2545_v24 = vmax.f32 %v1961_v18, 0.0 }
 0x1f5   :  { %v2949_v51 = vsel %vm2655_vm3, %v2536_v26, 0.0  ;;  %v4154_v9 = vpop.f32.mrb[140].mxu0  ;;  %v2963_v46 = vsel %vm2655_vm3, %v2543_v43, 0.0  ;;  %v1969_v36 = vadd.f32 %v5634_v44, %v5067_v2  ;;  %v2546_v21 = vmax.f32 %v1964_v38, 0.0 }
 0x1f6   :  { %v5779_v40 = vsel %vm3255_vm7, %v3246_v37, %v5606_v12  ;;  %v2950_v48 = vadd.f32 %v2949_v51, %v2948_v60  ;;  %v1936_v16 = vpop.f32.mrb[141].mxu0  ;;  %v1945_v4 = vadd.f32 %v5634_v44, %v4154_v9  ;;  %v2965_v31 = vsel %vm2655_vm3, %v2544_v28, 0.0 }
 0x1f7   :  { %v1937_v53 = vadd.f32 %v5634_v44, %v1936_v16  ;;  %v4155_v42 = vpop.f32.mrb[142].mxu0  ;;  %v1972_v63 = vadd.f32 %v5634_v44, %v5075_v11  ;;  %v2967_v41 = vsel %vm2655_vm3, %v2545_v24, 0.0  ;;  %v1977_v1 = vadd.f32 %v5634_v44, %v5056_v59 }
 0x1f8   :  { %v2952_v13 = vadd.f32 %v2951_v10, %v2950_v48  ;;  %v1939_v14 = vpop.f32.mrb[143].mxu0  ;;  %v1948_v52 = vadd.f32 %v5634_v44, %v4155_v42  ;;  %v2541_v5 = vmax.f32 %v1945_v4, 0.0  ;;  %v2547_v26 = vmax.f32 %v1969_v36, 0.0 }
 0x1f9   :  { %v2539_v62 = vmax.f32 %v1937_v53, 0.0  ;;  %v1940_v57 = vadd.f32 %v5634_v44, %v1939_v14  ;;  %v2969_v60 = vsel %vm2655_vm3, %v2546_v21, 0.0  ;;  %v1980_v2 = vadd.f32 %v5634_v44, %v5070_v6 }
 0x1fa   :  { %v2954_v12 = vadd.f32 %v2953_v55, %v2952_v13  ;;  %v2542_v32 = vmax.f32 %v1948_v52, 0.0  ;;  %v2959_v50 = vsel %vm2655_vm3, %v2541_v5, 0.0  ;;  %v2548_v58 = vmax.f32 %v1972_v63, 0.0 }
 0x1fb   :  { %v2955_v22 = vsel %vm2655_vm3, %v2539_v62, 0.0  ;;  %v2540_v30 = vmax.f32 %v1940_v57, 0.0  ;;  %v2549_v9 = vmax.f32 %v1977_v1, 0.0  ;;  %v2971_v48 = vsel %vm2655_vm3, %v2547_v26, 0.0 }
 0x1fc   :  { %v2956_v45 = vadd.f32 %v2955_v22, %v2954_v12  ;;  %v2961_v47 = vsel %vm2655_vm3, %v2542_v32, 0.0  ;;  %v1985_v11 = vadd.f32 %v5634_v44, %v5093_v29  ;;  %v2550_v10 = vmax.f32 %v1980_v2, 0.0 }
 0x1fd   :  { %v2957_v19 = vsel %vm2655_vm3, %v2540_v30, 0.0  ;;  %v2973_v4 = vsel %vm2655_vm3, %v2548_v58, 0.0  ;;  %v1988_v59 = vadd.f32 %v5634_v44, %v5100_v39  ;;  %v2975_v42 = vsel %vm2655_vm3, %v2549_v9, 0.0 }
 0x1fe   :  { %v2958_v25 = vadd.f32 %v2957_v19, %v2956_v45  ;;  %v1993_v6 = vadd.f32 %v5634_v44, %v5085_v23  ;;  %v2551_v13 = vmax.f32 %v1985_v11, 0.0  ;;  %v2977_v55 = vsel %vm2655_vm3, %v2550_v10, 0.0 }
 0x1ff   :  { %v1996_v29 = vadd.f32 %v5634_v44, %v5095_v33  ;;  %v2552_v62 = vmax.f32 %v1988_v59, 0.0  ;;  %v2001_v39 = vadd.f32 %v5634_v44, %v5117_v61  ;;  %v2004_v23 = vadd.f32 %v5634_v44, %v5124_v8 }
 0x200   :  { %v2960_v35 = vadd.f32 %v2959_v50, %v2958_v25  ;;  %v2553_v57 = vmax.f32 %v1993_v6, 0.0  ;;  %v2979_v12 = vsel %vm2655_vm3, %v2551_v13, 0.0  ;;  %v3064_v30 = vrot.slane %v5314_v56, 4 }
 0x201   :  { %v2554_v5 = vmax.f32 %v1996_v29, 0.0  ;;  %v2981_v22 = vsel %vm2655_vm3, %v2552_v62, 0.0  ;;  %v3133_v45 = vrot.slane %v5556_v15, 4  ;;  %v2009_v32 = vadd.f32 %v5634_v44, %v5109_v54 }
 0x202   :  { %v2962_v34 = vadd.f32 %v2961_v47, %v2960_v35  ;;  %v2983_v7 = vsel %vm2655_vm3, %v2553_v57, 0.0  ;;  %v2555_v19 = vmax.f32 %v2001_v39, 0.0  ;;  %v3202_v61 = vrot.slane %v5771_v17, 4 }
 0x203   :  { %v2985_v18 = vsel %vm2655_vm3, %v2554_v5, 0.0  ;;  %v2012_v43 = vadd.f32 %v5634_v44, %v5119_v0  ;;  %v2556_v8 = vmax.f32 %v2004_v23, 0.0  ;;  %v3065_v50 = vadd.f32 %v3064_v30, %v5314_v56 }
 0x204   :  { %v2964_v49 = vadd.f32 %v2963_v46, %v2962_v34  ;;  %v3134_v35 = vadd.f32 %v3133_v45, %v5556_v15  ;;  %v2557_v28 = vmax.f32 %v2009_v32, 0.0  ;;  %v2987_v47 = vsel %vm2655_vm3, %v2555_v19, 0.0 }
 0x205   :  { %v3203_v54 = vadd.f32 %v3202_v61, %v5771_v17  ;;  %v2558_v24 = vmax.f32 %v2012_v43, 0.0  ;;  %v2989_v46 = vsel %vm2655_vm3, %v2556_v8, 0.0  ;;  %v3066_v36 = vrot.slane %v3065_v50, 2  ;;  %v4454_v43 = vld [vmem:[%s5941_s3 + $0x8] sm:$0xff]   ;;  %v4455_v8 = vld [vmem:[%s5941_s3 + $0x10] sm:$0xff]  }
 0x206   :  { %v2966_v20 = vadd.f32 %v2965_v31, %v2964_v49  ;;  %v3135_v49 = vrot.slane %v3134_v35, 2  ;;  %v2991_v0 = vsel %vm2655_vm3, %v2557_v28, 0.0 }
 0x207   :  { %v3204_v44 = vrot.slane %v3203_v54, 2  ;;  %v2993_v56 = vsel %vm2655_vm3, %v2558_v24, 0.0  ;;  %v3067_v15 = vadd.f32 %v3066_v36, %v3065_v50  ;;  %v4456_v50 = vld [vmem:[%s5941_s3 + $0x18] sm:$0xff]  }
 0x208   :  { %v2968_v37 = vadd.f32 %v2967_v41, %v2966_v20  ;;  %v3136_v63 = vadd.f32 %v3135_v49, %v3134_v35 }
 0x209   :  { %v3205_v41 = vadd.f32 %v3204_v44, %v3203_v54  ;;  %v3068_v26 = vrot.slane %v3067_v15, 1 }
 0x20a   :  { %v2970_v51 = vadd.f32 %v2969_v60, %v2968_v37  ;;  %v3137_v17 = vrot.slane %v3136_v63, 1 }
 0x20b   :  { %v3206_v60 = vrot.slane %v3205_v41, 1  ;;  %v3069_v58 = vadd.f32 %v3068_v26, %v3067_v15 }
 0x20c   :  { %v2972_v16 = vadd.f32 %v2971_v48, %v2970_v51  ;;  %v3138_v51 = vadd.f32 %v3137_v17, %v3136_v63 }
 0x20d   :  { %v3207_v48 = vadd.f32 %v3206_v60, %v3205_v41 }
 0x20e   :  { %v2974_v53 = vadd.f32 %v2973_v4, %v2972_v16  ;;  %v3214_v16 = vmul.f32 0.00390625, %v3069_v58  ;;  %v3215_v10 = vmul.f32 0.00390625, %v3138_v51  ;;  %v4457_v51 = vld [vmem:[%s5941_s3 + $0x20] sm:$0xff]  }
 0x20f   :  { %v3216_v59 = vmul.f32 0.00390625, %v3207_v48  ;;  %v4459_v48 = vld [vmem:[%s5941_s3 + $0x30] sm:$0xff]  }
 0x210   :  { %v2976_v14 = vadd.f32 %v2975_v42, %v2974_v53  ;;  %v3222_v42 = vpack.c.bf16 %v3214_v16, %v3214_v16  ;;  %v3223_v6 = vpack.c.bf16 %v3215_v10, %v3215_v10 }
 0x212   :  { %v2978_v52 = vadd.f32 %v2977_v55, %v2976_v14  ;;  %v3224_v14 = vpack.c.bf16 %v3216_v59, %v3216_v59  ;;  %v3248_v29 = vunpack.c.l.b16 %v3222_v42  ;;  %v3249_v62 = vunpack.c.l.b16 %v3223_v6 }
 0x214   :  { %v2980_v27 = vadd.f32 %v2979_v12, %v2978_v52  ;;  %v3250_v57 = vunpack.c.l.b16 %v3224_v14  ;;  %v4461_v14 = vld [vmem:[%s5942_s4] sm:$0xff]  }
 0x216   :  { %v2982_v33 = vadd.f32 %v2981_v22, %v2980_v27  ;;  %v3847_v22 = vld [vmem:[%s5943_s5 + $0x5] ss:$0 sm:$0xff] }
 0x217   :  { %3343 = vrot.lane.b32.xlu1 %v3847_v22, %s4500_s30 }
 0x218   :  { %v2984_v25 = vadd.f32 %v2983_v7, %v2982_v33  ;;  %v3846_v7 = vld [vmem:[%s5943_s5 + $0x2] ss:$0 sm:$0xff] }
 0x21a   :  { %v2986_v38 = vadd.f32 %v2985_v18, %v2984_v25  ;;  %v4502_v25 = vmov 0   ;;  %v4453_v18 = vld [vmem:[%s5941_s3] sm:$0xff]  }
 0x21b   :  { %4319 = vset.pattern.permute.xlu1 %v4502_v25  ;;  %4320 = vset.pattern.permute.xlu0 %v4502_v25 }
 0x21c   :  { %v2988_v34 = vadd.f32 %v2987_v47, %v2986_v38 }
 0x21e   :  { %v2990_v21 = vadd.f32 %v2989_v46, %v2988_v34 }
 0x220   :  { %v2992_v31 = vadd.f32 %v2991_v0, %v2990_v21 }
 0x222   :  { %v2994_v20 = vadd.f32 %v2993_v56, %v2992_v31 }
 0x224   :  { %v2995_v1 = vrot.slane %v2994_v20, 4 }
 0x226   :  { %v2996_v37 = vadd.f32 %v2995_v1, %v2994_v20 }
 0x228   :  { %v2997_v2 = vrot.slane %v2996_v37, 2 }
 0x22a   :  { %v2998_v9 = vadd.f32 %v2997_v2, %v2996_v37 }
 0x22c   :  { %v2999_v11 = vrot.slane %v2998_v9, 1 }
 0x22e   :  { %v3000_v4 = vadd.f32 %v2999_v11, %v2998_v9  ;;  %v4458_v9 = vld [vmem:[%s5941_s3 + $0x28] sm:$0xff]   ;;  %v4460_v11 = vld [vmem:[%s5941_s3 + $0x38] sm:$0xff]  }
 0x230   :  { %v3213_v53 = vmul.f32 0.00390625, %v3000_v4 }
 0x232   :  { %v3221_v13 = vpack.c.bf16 %v3213_v53, %v3213_v53 }
 0x234   :  { %v3247_v55 = vunpack.c.l.b16 %v3221_v13 }
 0x236   :  { %v3258_v52 = vsel %vm3257_vm8, %v3247_v55, %v5779_v40  ;;  %v3842_v40 = vld [vmem:[%s5943_s5 + $0x1] ss:$0 sm:$0xff] }
 0x237   :  { %v3260_v12 = vsel %vm3259_vm9, %v3248_v29, %v3258_v52  ;;  %v4462_v29 = vld [vmem:[%s5942_s4 + $0x8] sm:$0xff]   ;;  %v4464_v52 = vld [vmem:[%s5942_s4 + $0x18] sm:$0xff]  }
 0x238   :  { %v3262_v39 = vsel %vm3261_vm10, %v3249_v62, %v3260_v12  ;;  %v4463_v62 = vld [vmem:[%s5942_s4 + $0x10] sm:$0xff]   ;;  %s3571_s4 = sshll.u32 %s4503_s14, 4  ;;  %s3572_s4 = int_to_ptr.vmem [resolvable:$true] %s3571_s4 }
 0x239   :  { %v3264_v27 = vsel %vm3263_vm11, %v3250_v57, %v3262_v39  ;;  %v30_v57 = vld [vmem:[%s5943_s5 + $0x3] sm:$0x1]  ;;  %s4473_s15 = scalar_lea.vmem %s3572_s4, 16  ;;  %s4477_s16 = scalar_lea.vmem %s3572_s4, 32 }
 0x23a   :  { %v3265_v5 = vpack.c.b16 %v3264_v27, %v3264_v27  ;;  %p4474_p0 = scmp.ne.s32.totalorder %s3572_s4, %s4473_s15  ;;  %p4478_p1 = scmp.lt.s32.totalorder %s3572_s4, %s3572_s4 }
 0x23b   :  { %p4479_p2 = scmp.lt.s32.totalorder %s4477_s16, %s4473_s15 }
 0x23c   :  { %4273 = vmatmul.mubr.msk.bf16.vlgmr.msra.gmra.mrb[112].mxu1 %vm2655_vm3, %v3265_v5 }
 0x23d   :  { %4292 = vmatprep.mubr.msk.bf16.mxu1 %vm4499_vm6, %v4498_v3  ;;  %4277 = vmatpush3.bf16.msra.mxu1 %v4453_v18  ;;  %p4480_p3 = por %p4479_p2, %p4478_p1 }
 0x23e   :  { %4278 = vmatprep.subr.bf16.mxu1 %v4498_v3 }
 0x23f   :  { %p4481_p4 = pnand %p4480_p3, %p4474_p0 }
 0x241   :  { %4279 = vmatpush3.bf16.msra.mxu1 %v4454_v43 }
 0x242   :  { %4280 = vmatprep.subr.bf16.mxu1 %v4498_v3 }
 0x245   :  { %4281 = vmatpush3.bf16.msra.mxu1 %v4455_v8 }
 0x246   :  { %4282 = vmatprep.subr.bf16.mxu1 %v4498_v3 }
 0x249   :  { %4283 = vmatpush3.bf16.msra.mxu1 %v4456_v50 }
 0x24a   :  { %4284 = vmatprep.subr.bf16.mxu1 %v4498_v3 }
 0x24d   :  { %4285 = vmatpush3.bf16.msra.mxu1 %v4457_v51 }
 0x24e   :  { %4286 = vmatprep.subr.bf16.mxu1 %v4498_v3 }
 0x251   :  { %4287 = vmatpush3.bf16.msra.mxu1 %v4458_v9 }
 0x252   :  { %4288 = vmatprep.subr.bf16.mxu1 %v4498_v3 }
 0x255   :  { %4289 = vmatpush3.bf16.msra.mxu1 %v4459_v48 }
 0x256   :  { %4290 = vmatprep.subr.bf16.mxu1 %v4498_v3 }
 0x259   :  { %4291 = vmatpush3.bf16.msra.mxu1 %v4460_v11 }
 0x25a   :  { %4296 = vmatprep.subr.bf16.mxu1 %v4498_v3 }
 0x289   :  { %v3344_v54 = vpop.permute.xlu1 %3343 }
 0x30f   :  { %v3315_v23 = vpop.f32.mrb[112].mxu1 }
 0x310   :  { %v5855_v30 = vadd.f32 %v3842_v40, %v3315_v23  ;;  %v4274_v45 = vpop.f32.mrb[113].mxu1 }
 0x311   :  { %v3318_v33 = vpop.f32.mrb[114].mxu1 }
 0x312   :  { %v3321_v32 = vmax.f32 %v5855_v30, 0.0  ;;  %v4275_v19 = vpop.f32.mrb[115].mxu1 }
 0x314   :  { %v3328_v61 = vmul.f32 %v3846_v7, %v3321_v32 }
 0x316   :  { %3329 = vadd.xlane.f32.xlu0 %v3328_v61 }
 0x32c   :  { %3339 = vrot.lane.b32.xlu0 %v3847_v22, %s4501_s11 }
 0x3a3   :  { %v3330_v35 = vpop.xlane.xlu0 %3329 }
 0x3a4   :  { %v3337_v38 = vadd.f32 %v3847_v22, %v3330_v35 }
 0x3a6   :  { %4465 = vtanh.f32 %v3337_v38 }
 0x3a7   :  { %v3340_v28 = vpop.permute.xlu0 %3339 }
 0x3b0   :  { %v4466_v47 = vpop.eup %4465 }
 0x3b1   :  { %v3342_v34 = vmul.f32 %v4466_v47, %v3340_v28 }
 0x3b3   :  { %v3346_v24 = vadd.f32 %v3344_v54, %v3342_v34 }
 0x3b5   :  { %v3348_v46 = vsel %vm3347_vm12, %v3346_v24, -inf }
 0x3b6   :  { %v3349_v36 = vrot.slane %v3348_v46, 4 }
 0x3b8   :  { %v3350_v49 = vmax.f32 %v3348_v46, %v3349_v36 }
 0x3ba   :  { %v3351_v21 = vrot.slane %v3350_v49, 2 }
 0x3bc   :  { %v3352_v0 = vmax.f32 %v3350_v49, %v3351_v21 }
 0x3be   :  { %v3353_v44 = vrot.slane %v3352_v0, 1 }
 0x3c0   :  { %v3354_v31 = vmax.f32 %v3352_v0, %v3353_v44 }
 0x3c2   :  { %v3355_v56 = vsub.f32 %v3346_v24, %v3354_v31 }
 0x3c4   :  { %v3356_v15 = vmul.f32 1.442695, %v3355_v56 }
 0x3c6   :  { %4467 = vpow2.f32 %v3356_v15 }
 0x3d0   :  { %v4468_v63 = vpop.eup %4467 }
 0x3d1   :  { %v3358_v20 = vsel %vm3347_vm12, %v4468_v63, 0.0 }
 0x3d2   :  { %v3359_v41 = vrot.slane %v3358_v20, 4 }
 0x3d4   :  { %v3360_v1 = vadd.f32 %v3359_v41, %v3358_v20 }
 0x3d6   :  { %v3361_v26 = vrot.slane %v3360_v1, 2 }
 0x3d8   :  { %v3362_v17 = vadd.f32 %v3361_v26, %v3360_v1 }
 0x3da   :  { %v3363_v37 = vrot.slane %v3362_v17, 1 }
 0x3dc   :  { %v3364_v60 = vadd.f32 %v3363_v37, %v3362_v17 }
 0x3de   :  { %4469 = vrcp.f32 %v3364_v60 }
 0x3e8   :  { %v4470_v2 = vpop.eup %4469 }
 0x3e9   :  { %v3366_v58 = vmul.f32 %v4470_v2, %v4468_v63 }
 0x3eb   :  { %3370 = vperm.xlu1 %4319, %v3366_v58   ;;  %3367 = vst.msk [vmem:[%s5945_s7] sm:$0xff] %vm3347_vm12, %v3366_v58 }
 0x46a   :  { %v3371_v16 = vpop.permute.xlu1 %3370 }
 0x46b   :  { %v3373_v10 = vmul.f32 %v3371_v16, %v3321_v32 }
 0x46d   :  { %v3374_v4 = vrot.slane %v3373_v10, 4 }
 0x46f   :  { %v3375_v59 = vadd.f32 %v3374_v4, %v3373_v10 }
 0x471   :  { %v3376_v53 = vrot.slane %v3375_v59, 2 }
 0x473   :  { %v3377_v42 = vadd.f32 %v3376_v53, %v3375_v59 }
 0x475   :  { %v3378_v6 = vrot.slane %v3377_v42, 1 }
 0x477   :  { %v3379_v13 = vadd.f32 %v3378_v6, %v3377_v42 }
 0x479   :  { %v3380_v55 = vpack.c.bf16 %v3379_v13, %v3379_v13 }
 0x47b   :  { %4293 = vmatmul.mubr.bf16.vlgmr.msra.gmra.mrb[116].mxu1 %v3380_v55 }
 0x47c   :  { %4297 = vmatpush3.bf16.msra.mxu1 %v4461_v14  ;;  %4304 = vmatprep.mubr.msk.bf16.mxu1 %vm4499_vm6, %v4498_v3 }
 0x47d   :  { %4298 = vmatprep.subr.bf16.mxu1 %v4498_v3 }
 0x480   :  { %4299 = vmatpush3.bf16.msra.mxu1 %v4462_v29 }
 0x481   :  { %4300 = vmatprep.subr.bf16.mxu1 %v4498_v3 }
 0x484   :  { %4301 = vmatpush3.bf16.msra.mxu1 %v4463_v62 }
 0x485   :  { %4302 = vmatprep.subr.bf16.mxu1 %v4498_v3  ;;  %v31_v3 = vld [vmem:[%s5943_s5 + $0x4] sm:$0x1] }
 0x488   :  { %4303 = vmatpush3.bf16.msra.mxu1 %v4464_v52 }
 0x54e   :  { %v3479_v12 = vpop.f32.mrb[116].mxu1 }
 0x54f   :  { %v3480_v39 = vadd.f32 %v3479_v12, %v30_v57  ;;  %v4294_v27 = vpop.f32.mrb[117].mxu1 }
 0x550   :  { %v3482_v5 = vpop.f32.mrb[118].mxu1 }
 0x551   :  { %v3485_v22 = vmax.f32 %v3480_v39, 0.0  ;;  %v4295_v40 = vpop.f32.mrb[119].mxu1 }
 0x553   :  { %v3486_v23 = vpack.c.bf16 %v3485_v22, %v3485_v22 }
 0x555   :  { %4305 = vmatmul.mubr.msk.bf16.vlgmr.msra.gmra.mrb[120].mxu1 %vm3519_vm13, %v3486_v23 }
 0x628   :  { %v3557_v30 = vpop.f32.mrb[120].mxu1 }
 0x629   :  { %v3558_v45 = vadd.f32 %v3557_v30, %v31_v3  ;;  %v4306_v33 = vpop.f32.mrb[121].mxu1 }
 0x62a   :  { %v3560_v7 = vpop.f32.mrb[122].mxu1 }
 0x62b   :  { %v4307_v32 = vpop.f32.mrb[123].mxu1  ;;  %3564 = vst.msk [vmem:[#allocation2] sm:$0x1] %vm3563_vm14, %v3558_v45 }
 0x62c   :  { %4484 = shalt.err (!%p4481_p4)
}
 0x62d   :  { %s4485_s18 = scalar_lea.hbm %s5944_s6, 16 }
 0x62e   :  { %p4486_p5 = scmp.ne.s32.totalorder %s5944_s6, %s4485_s18  ;;  %p4489_p6 = scmp.lt.u32.totalorder %s4485_s18, %s5944_s6 }
 0x630   :  { %p4491_p7 = pnand %p4489_p6, %p4486_p5 }
 0x632   :  { %4494 = shalt.err (!%p4491_p7)
}
 0x633   :  { %3574 = dma.vmem_to_hbm [thread:$0]  %s3572_s4, 16, %s5944_s6, [#allocation3]  }
 0x634   :  { %4495 = dma.done.wait [#allocation3], 16  }
 0x635   :  { %4496 = vsyncadd [#allocation3], 4294967280 }
 0x636   :  { %3582 = vsyncpa [#allocation3], 1 }

</bundles_post_ra>
